<compile_context>
chip_gen: v5e
topology: v5e:2x2
jax: 0.10.0
libtpu: 0.0.40
codegen_flags: <defaults>
</compile_context>

<pallas_src>
import functools

import jax
import jax.numpy as jnp
from jax.experimental import pallas as pl
from jax.experimental.pallas import tpu as pltpu  # noqa: F401


def _round_up(n, m):
    return ((n + m - 1) // m) * m


# ----------------------------- Pallas kernel -------------------------------

def lstm_branch_kernel(*refs, num_layers, hidden_dim, depth, batch, input_dim):
    """Fused LSTMBranch forward: all LSTM layers + final Linear.

    refs layout (inputs, then the single output):
      refs[0]            : x2d   (B*D, In)   batch-major rows (row = b*D + t)
      refs[1 + 3*l + 0]  : W_ih^T of layer l,  (In_l, 4H)
      refs[1 + 3*l + 1]  : W_hh^T of layer l,  (H, 4H)
      refs[1 + 3*l + 2]  : (b_ih + b_hh) of layer l, (1, 4H)
      refs[3*L + 1]      : fc weight^T, (H, out)
      refs[3*L + 2]      : fc bias, (1, out)
      refs[3*L + 3]      : output, (B, out)
    """
    D, B, H, In, L = depth, batch, hidden_dim, input_dim, num_layers
    B_pad = max(8, _round_up(B, 8))          # sublane-tile aligned batch
    f32 = jnp.float32

    x_ref = refs[0]
    fc_w_ref = refs[3 * L + 1]
    fc_b_ref = refs[3 * L + 2]
    out_ref = refs[3 * L + 3]

    # ---- hoisted per-lane gate-activation constants ------------------------
    # PyTorch gate order (i, f, g, o): tanh on lanes [2H, 3H), sigmoid else.
    # tanh(x) = 2*sigmoid(2x) - 1  ->  one full-width sigmoid per step:
    #   act = a * sigmoid(a * gates) + b   with  a in {1,2},  b in {0,-1}.
    lane = jax.lax.broadcasted_iota(jnp.int32, (B_pad, 4 * H), 1)
    tanh_lane = (lane >= 2 * H) & (lane < 3 * H)
    gate_a = jnp.where(tanh_lane, 2.0, 1.0).astype(f32)
    gate_b = jnp.where(tanh_lane, -1.0, 0.0).astype(f32)

    # ---- one-time in-kernel relayout of x (off the serial path) ------------
    # x arrives batch-major (B*D, In) (free reshape of torch x.view).  Build a
    # time-major, batch-padded (D*B_pad, In) slab so the hoisted layer-0
    # projection result can be sliced per step on exact 8-sublane boundaries.
    x2 = x_ref[...]                                           # (B*D, In)
    zero_rows = (jnp.zeros((B_pad - B, In), f32)
                 if B_pad > B else None)
    blocks = []
    for t in range(D):
        rows = [x2[b * D + t:b * D + t + 1, :] for b in range(B)]   # (1, In) each
        if zero_rows is not None:
            rows.append(zero_rows)
        blocks.append(jnp.concatenate(rows, axis=0))                # (B_pad, In)
    x_tm = jnp.concatenate(blocks, axis=0)                          # (D*B_pad, In)

    # ---- layer-0 input projection: ONE hoisted MXU matmul (bias folded) ----
    w_ih = [refs[1 + 3 * l][...] for l in range(L)]
    w_hh = [refs[2 + 3 * l][...] for l in range(L)]
    bias = [refs[3 + 3 * l][...] for l in range(L)]
    xg0 = jnp.dot(x_tm, w_ih[0], preferred_element_type=f32) + bias[0]

    # ---- wavefront recurrence ----------------------------------------------
    # Time-major outer loop, layers inner: layer l at step t consumes the
    # hidden state layer l-1 produced for the SAME step, so the serial chain
    # is D + L - 1 cell updates (vs D*L with whole-sequence buffering).
    h = [jnp.zeros((B_pad, H), f32) for _ in range(L)]
    c = [jnp.zeros((B_pad, H), f32) for _ in range(L)]

    for t in range(D):
        for l in range(L):
            if l == 0:
                pre = xg0[t * B_pad:(t + 1) * B_pad, :]       # aligned (B_pad, 4H)
            else:
                pre = jnp.dot(h[l - 1], w_ih[l],
                              preferred_element_type=f32) + bias[l]
            gates = pre + jnp.dot(h[l], w_hh[l], preferred_element_type=f32)
            act = gate_a * jax.nn.sigmoid(gate_a * gates) + gate_b
            i_g = act[:, 0 * H:1 * H]
            f_g = act[:, 1 * H:2 * H]
            g_g = act[:, 2 * H:3 * H]
            o_g = act[:, 3 * H:4 * H]
            c[l] = f_g * c[l] + i_g * g_g
            h[l] = o_g * jnp.tanh(c[l])

    # ---- fused final Linear on the last layer's last hidden state ----------
    fc_out = (jnp.dot(h[L - 1], fc_w_ref[...], preferred_element_type=f32)
              + fc_b_ref[...])                                # (B_pad, out)
    out_ref[...] = fc_out[:B, :].astype(out_ref.dtype)


# ------------------------------- wrappers -----------------------------------

def prepare_lstm_branch_params(lstm_params, fc_w, fc_b):
    """One-time parameter preprocessing (hoisted out of the per-call path)."""
    args = []
    for (w_ih, w_hh, b_ih, b_hh) in lstm_params:
        four_h = w_ih.shape[0]
        args.append(jnp.asarray(w_ih, jnp.float32).T)                 # (In_l, 4H)
        args.append(jnp.asarray(w_hh, jnp.float32).T)                 # (H, 4H)
        args.append((jnp.asarray(b_ih, jnp.float32)
                     + jnp.asarray(b_hh, jnp.float32)).reshape(1, four_h))
    out_dim = fc_w.shape[0]
    args.append(jnp.asarray(fc_w, jnp.float32).T)                     # (H, out)
    args.append(jnp.asarray(fc_b, jnp.float32).reshape(1, out_dim))   # (1, out)
    return tuple(args)


@jax.jit
def lstm_branch_forward(x, prepped):
    """x: (B, C, D, H, W) -> (B, convnext_dim). Single fused pallas_call."""
    B, C, D, Hs, Ws = x.shape
    In = C * Hs * Ws
    num_layers = (len(prepped) - 2) // 3
    hidden_dim = prepped[1].shape[0]          # W_hh^T is (H, 4H)
    out_dim = prepped[-1].shape[-1]

    # Literal torch `x.view(B, depth, -1)`: raw row-major reinterpretation.
    # (B*D, In) keeps the same raw order -> a free bitcast reshape, the only
    # wrapper-side op besides the pallas_call itself.
    x_flat = jnp.reshape(x, (B * D, In)).astype(jnp.float32)

    kernel = functools.partial(
        lstm_branch_kernel, num_layers=num_layers, hidden_dim=hidden_dim,
        depth=D, batch=B, input_dim=In)

    # No grid: one invocation, every operand is a full-array VMEM block
    # (total footprint is KB-scale, far under any generation's VMEM).
    return pl.pallas_call(
        kernel,
        out_shape=jax.ShapeDtypeStruct((B, out_dim), jnp.float32),
    )(x_flat, *prepped)


# --------------------------- pure-JAX reference ------------------------------

def lstm_branch_ref(x, lstm_params, fc_w, fc_b):
    B, C, D, H, W = x.shape
    inp = jnp.reshape(x, (B, D, C * H * W))
    for (w_ih, w_hh, b_ih, b_hh) in lstm_params:
        Hd = w_hh.shape[1]
        h = jnp.zeros((B, Hd), jnp.float32)
        c = jnp.zeros((B, Hd), jnp.float32)
        outs = []
        for t in range(D):
            g = inp[:, t] @ w_ih.T + b_ih + h @ w_hh.T + b_hh
            i = jax.nn.sigmoid(g[:, :Hd])
            f = jax.nn.sigmoid(g[:, Hd:2 * Hd])
            gg = jnp.tanh(g[:, 2 * Hd:3 * Hd])
            o = jax.nn.sigmoid(g[:, 3 * Hd:])
            c = f * c + i * gg
            h = o * jnp.tanh(c)
            outs.append(h)
        inp = jnp.stack(outs, axis=1)
    return inp[:, -1] @ fc_w.T + fc_b


# --------------------------------- main --------------------------------------

if __name__ == "__main__":
    # Small shapes consistent with the module.
    B, C, D, Hsp, Wsp = 2, 4, 8, 4, 4          # depth D = LSTM sequence length
    input_dim = C * Hsp * Wsp                  # 64 (what x.view implies)
    hidden_dim = 32
    num_layers = 2
    convnext_dim = 16

    key = jax.random.PRNGKey(0)
    keys = jax.random.split(key, 4 * num_layers + 3)

    # Deterministic parameter init (PyTorch-style uniform(-1/sqrt(H), 1/sqrt(H))).
    k = 1.0 / jnp.sqrt(hidden_dim).astype(jnp.float32)
    lstm_params = []
    ki = 0
    for layer in range(num_layers):
        in_dim = input_dim if layer == 0 else hidden_dim
        w_ih = jax.random.uniform(keys[ki + 0], (4 * hidden_dim, in_dim),
                                  jnp.float32, -k, k)
        w_hh = jax.random.uniform(keys[ki + 1], (4 * hidden_dim, hidden_dim),
                                  jnp.float32, -k, k)
        b_ih = jax.random.uniform(keys[ki + 2], (4 * hidden_dim,),
                                  jnp.float32, -k, k)
        b_hh = jax.random.uniform(keys[ki + 3], (4 * hidden_dim,),
                                  jnp.float32, -k, k)
        lstm_params.append((w_ih, w_hh, b_ih, b_hh))
        ki += 4

    fc_w = jax.random.uniform(keys[ki + 0], (convnext_dim, hidden_dim),
                              jnp.float32, -k, k)
    fc_b = jax.random.uniform(keys[ki + 1], (convnext_dim,),
                              jnp.float32, -k, k)

    x = jax.random.normal(keys[ki + 2], (B, C, D, Hsp, Wsp), jnp.float32)

    # One-time parameter prep (transposes / bias fusion hoisted off the
    # per-call path), then the fused forward.
    prepped = prepare_lstm_branch_params(lstm_params, fc_w, fc_b)
    out = lstm_branch_forward(x, prepped)
    out = jax.block_until_ready(out)

    ref = lstm_branch_ref(x, lstm_params, fc_w, fc_b)
    assert out.shape == (B, convnext_dim)
    assert jnp.allclose(out, ref, atol=1e-5, rtol=1e-5), (
        f"mismatch: max abs err = {jnp.max(jnp.abs(out - ref))}")

    print("KERNEL_OK")
</pallas_src>

<mosaic_0001>
module attributes {stable_mosaic.version = 11 : i64} {
  func.func @lstm_branch_kernel(%arg0: memref<16x64xf32, #tpu.memory_space<vmem>>, %arg1: memref<64x128xf32, #tpu.memory_space<vmem>>, %arg2: memref<32x128xf32, #tpu.memory_space<vmem>>, %arg3: memref<1x128xf32, #tpu.memory_space<vmem>>, %arg4: memref<32x128xf32, #tpu.memory_space<vmem>>, %arg5: memref<32x128xf32, #tpu.memory_space<vmem>>, %arg6: memref<1x128xf32, #tpu.memory_space<vmem>>, %arg7: memref<32x16xf32, #tpu.memory_space<vmem>>, %arg8: memref<1x16xf32, #tpu.memory_space<vmem>>, %arg9: memref<2x16xf32, #tpu.memory_space<vmem>>) attributes {dimension_semantics = [], scalar_prefetch = 0 : i64, scratch_operands = 0 : i64, tpu.core_type = #tpu.core_type<tc>} {
    %0 = tpu.iota {dimensions = array<i32: 1>} : vector<8x128xi32>
    %c64_i32 = arith.constant 64 : i32
    %1 = vector.broadcast %c64_i32 : i32 to vector<8x128xi32>
    %2 = arith.cmpi sge, %0, %1 : vector<8x128xi32>
    %c96_i32 = arith.constant 96 : i32
    %3 = vector.broadcast %c96_i32 : i32 to vector<8x128xi32>
    %4 = arith.cmpi slt, %0, %3 : vector<8x128xi32>
    %5 = arith.andi %2, %4 : vector<8x128xi1>
    %cst = arith.constant 2.000000e+00 : f32
    %cst_0 = arith.constant 1.000000e+00 : f32
    %6 = vector.broadcast %cst : f32 to vector<8x128xf32>
    %7 = vector.broadcast %cst_0 : f32 to vector<8x128xf32>
    %8 = arith.select %5, %6, %7 : vector<8x128xi1>, vector<8x128xf32>
    %cst_1 = arith.constant -1.000000e+00 : f32
    %cst_2 = arith.constant 0.000000e+00 : f32
    %9 = vector.broadcast %cst_1 : f32 to vector<8x128xf32>
    %10 = vector.broadcast %cst_2 : f32 to vector<8x128xf32>
    %11 = arith.select %5, %9, %10 : vector<8x128xi1>, vector<8x128xf32>
    %c0 = arith.constant 0 : index
    %c0_3 = arith.constant 0 : index
    %12 = vector.load %arg0[%c0, %c0_3] : memref<16x64xf32, #tpu.memory_space<vmem>>, vector<16x64xf32>
    %cst_4 = arith.constant 0.000000e+00 : f32
    %13 = vector.broadcast %cst_4 : f32 to vector<6x64xf32>
    %14 = vector.extract_strided_slice %12 {offsets = [0, 0], sizes = [1, 64], strides = [1, 1]} : vector<16x64xf32> to vector<1x64xf32>
    %15 = vector.extract_strided_slice %12 {offsets = [8, 0], sizes = [1, 64], strides = [1, 1]} : vector<16x64xf32> to vector<1x64xf32>
    %16 = tpu.concatenate %14, %15, %13 in 0 : vector<1x64xf32>, vector<1x64xf32>, vector<6x64xf32> -> vector<8x64xf32>
    %17 = vector.extract_strided_slice %12 {offsets = [1, 0], sizes = [1, 64], strides = [1, 1]} : vector<16x64xf32> to vector<1x64xf32>
    %18 = vector.extract_strided_slice %12 {offsets = [9, 0], sizes = [1, 64], strides = [1, 1]} : vector<16x64xf32> to vector<1x64xf32>
    %19 = tpu.concatenate %17, %18, %13 in 0 : vector<1x64xf32>, vector<1x64xf32>, vector<6x64xf32> -> vector<8x64xf32>
    %20 = vector.extract_strided_slice %12 {offsets = [2, 0], sizes = [1, 64], strides = [1, 1]} : vector<16x64xf32> to vector<1x64xf32>
    %21 = vector.extract_strided_slice %12 {offsets = [10, 0], sizes = [1, 64], strides = [1, 1]} : vector<16x64xf32> to vector<1x64xf32>
    %22 = tpu.concatenate %20, %21, %13 in 0 : vector<1x64xf32>, vector<1x64xf32>, vector<6x64xf32> -> vector<8x64xf32>
    %23 = vector.extract_strided_slice %12 {offsets = [3, 0], sizes = [1, 64], strides = [1, 1]} : vector<16x64xf32> to vector<1x64xf32>
    %24 = vector.extract_strided_slice %12 {offsets = [11, 0], sizes = [1, 64], strides = [1, 1]} : vector<16x64xf32> to vector<1x64xf32>
    %25 = tpu.concatenate %23, %24, %13 in 0 : vector<1x64xf32>, vector<1x64xf32>, vector<6x64xf32> -> vector<8x64xf32>
    %26 = vector.extract_strided_slice %12 {offsets = [4, 0], sizes = [1, 64], strides = [1, 1]} : vector<16x64xf32> to vector<1x64xf32>
    %27 = vector.extract_strided_slice %12 {offsets = [12, 0], sizes = [1, 64], strides = [1, 1]} : vector<16x64xf32> to vector<1x64xf32>
    %28 = tpu.concatenate %26, %27, %13 in 0 : vector<1x64xf32>, vector<1x64xf32>, vector<6x64xf32> -> vector<8x64xf32>
    %29 = vector.extract_strided_slice %12 {offsets = [5, 0], sizes = [1, 64], strides = [1, 1]} : vector<16x64xf32> to vector<1x64xf32>
    %30 = vector.extract_strided_slice %12 {offsets = [13, 0], sizes = [1, 64], strides = [1, 1]} : vector<16x64xf32> to vector<1x64xf32>
    %31 = tpu.concatenate %29, %30, %13 in 0 : vector<1x64xf32>, vector<1x64xf32>, vector<6x64xf32> -> vector<8x64xf32>
    %32 = vector.extract_strided_slice %12 {offsets = [6, 0], sizes = [1, 64], strides = [1, 1]} : vector<16x64xf32> to vector<1x64xf32>
    %33 = vector.extract_strided_slice %12 {offsets = [14, 0], sizes = [1, 64], strides = [1, 1]} : vector<16x64xf32> to vector<1x64xf32>
    %34 = tpu.concatenate %32, %33, %13 in 0 : vector<1x64xf32>, vector<1x64xf32>, vector<6x64xf32> -> vector<8x64xf32>
    %35 = vector.extract_strided_slice %12 {offsets = [7, 0], sizes = [1, 64], strides = [1, 1]} : vector<16x64xf32> to vector<1x64xf32>
    %36 = vector.extract_strided_slice %12 {offsets = [15, 0], sizes = [1, 64], strides = [1, 1]} : vector<16x64xf32> to vector<1x64xf32>
    %37 = tpu.concatenate %35, %36, %13 in 0 : vector<1x64xf32>, vector<1x64xf32>, vector<6x64xf32> -> vector<8x64xf32>
    %38 = tpu.concatenate %16, %19, %22, %25, %28, %31, %34, %37 in 0 : vector<8x64xf32>, vector<8x64xf32>, vector<8x64xf32>, vector<8x64xf32>, vector<8x64xf32>, vector<8x64xf32>, vector<8x64xf32>, vector<8x64xf32> -> vector<64x64xf32>
    %c0_5 = arith.constant 0 : index
    %c0_6 = arith.constant 0 : index
    %39 = vector.load %arg1[%c0_5, %c0_6] : memref<64x128xf32, #tpu.memory_space<vmem>>, vector<64x128xf32>
    %c0_7 = arith.constant 0 : index
    %c0_8 = arith.constant 0 : index
    %40 = vector.load %arg4[%c0_7, %c0_8] : memref<32x128xf32, #tpu.memory_space<vmem>>, vector<32x128xf32>
    %c0_9 = arith.constant 0 : index
    %c0_10 = arith.constant 0 : index
    %41 = vector.load %arg2[%c0_9, %c0_10] : memref<32x128xf32, #tpu.memory_space<vmem>>, vector<32x128xf32>
    %c0_11 = arith.constant 0 : index
    %c0_12 = arith.constant 0 : index
    %42 = vector.load %arg5[%c0_11, %c0_12] : memref<32x128xf32, #tpu.memory_space<vmem>>, vector<32x128xf32>
    %c0_13 = arith.constant 0 : index
    %c0_14 = arith.constant 0 : index
    %43 = vector.load %arg3[%c0_13, %c0_14] : memref<1x128xf32, #tpu.memory_space<vmem>>, vector<1x128xf32>
    %c0_15 = arith.constant 0 : index
    %c0_16 = arith.constant 0 : index
    %44 = vector.load %arg6[%c0_15, %c0_16] : memref<1x128xf32, #tpu.memory_space<vmem>>, vector<1x128xf32>
    %cst_17 = arith.constant dense<0.000000e+00> : vector<64x128xf32>
    %45 = tpu.matmul %38, %39, %cst_17 {dimension_numbers = #tpu.dot_dimension_numbers<[1], [0], [0], [1], [0, 0, 1, 1], [], []>} : vector<64x64xf32>, vector<64x128xf32>, vector<64x128xf32> -> vector<64x128xf32>
    %46 = vector.broadcast %43 : vector<1x128xf32> to vector<64x128xf32>
    %47 = arith.addf %45, %46 : vector<64x128xf32>
    %cst_18 = arith.constant 0.000000e+00 : f32
    %48 = vector.broadcast %cst_18 : f32 to vector<8x32xf32>
    %cst_19 = arith.constant 0.000000e+00 : f32
    %49 = vector.broadcast %cst_19 : f32 to vector<8x32xf32>
    %cst_20 = arith.constant 0.000000e+00 : f32
    %50 = vector.broadcast %cst_20 : f32 to vector<8x32xf32>
    %cst_21 = arith.constant 0.000000e+00 : f32
    %51 = vector.broadcast %cst_21 : f32 to vector<8x32xf32>
    %52 = vector.extract_strided_slice %47 {offsets = [0, 0], sizes = [8, 128], strides = [1, 1]} : vector<64x128xf32> to vector<8x128xf32>
    %cst_22 = arith.constant dense<0.000000e+00> : vector<8x128xf32>
    %53 = tpu.matmul %48, %41, %cst_22 {dimension_numbers = #tpu.dot_dimension_numbers<[1], [0], [0], [1], [0, 0, 1, 1], [], []>} : vector<8x32xf32>, vector<32x128xf32>, vector<8x128xf32> -> vector<8x128xf32>
    %54 = arith.addf %52, %53 : vector<8x128xf32>
    %55 = arith.mulf %8, %54 : vector<8x128xf32>
    %56 = arith.negf %55 : vector<8x128xf32>
    %57 = math.exp %56 : vector<8x128xf32>
    %cst_23 = arith.constant 1.000000e+00 : f32
    %58 = vector.broadcast %cst_23 : f32 to vector<8x128xf32>
    %59 = arith.addf %58, %57 : vector<8x128xf32>
    %60 = arith.divf %58, %59 : vector<8x128xf32>
    %61 = arith.mulf %8, %60 : vector<8x128xf32>
    %62 = arith.addf %61, %11 : vector<8x128xf32>
    %63 = vector.extract_strided_slice %62 {offsets = [0, 0], sizes = [8, 32], strides = [1, 1]} : vector<8x128xf32> to vector<8x32xf32>
    %64 = vector.extract_strided_slice %62 {offsets = [0, 32], sizes = [8, 32], strides = [1, 1]} : vector<8x128xf32> to vector<8x32xf32>
    %65 = vector.extract_strided_slice %62 {offsets = [0, 64], sizes = [8, 32], strides = [1, 1]} : vector<8x128xf32> to vector<8x32xf32>
    %66 = vector.extract_strided_slice %62 {offsets = [0, 96], sizes = [8, 32], strides = [1, 1]} : vector<8x128xf32> to vector<8x32xf32>
    %67 = arith.mulf %64, %50 : vector<8x32xf32>
    %68 = arith.mulf %63, %65 : vector<8x32xf32>
    %69 = arith.addf %67, %68 : vector<8x32xf32>
    %70 = math.tanh %69 : vector<8x32xf32>
    %71 = arith.mulf %66, %70 : vector<8x32xf32>
    %cst_24 = arith.constant dense<0.000000e+00> : vector<8x128xf32>
    %72 = tpu.matmul %71, %40, %cst_24 {dimension_numbers = #tpu.dot_dimension_numbers<[1], [0], [0], [1], [0, 0, 1, 1], [], []>} : vector<8x32xf32>, vector<32x128xf32>, vector<8x128xf32> -> vector<8x128xf32>
    %73 = vector.broadcast %44 : vector<1x128xf32> to vector<8x128xf32>
    %74 = arith.addf %72, %73 : vector<8x128xf32>
    %cst_25 = arith.constant dense<0.000000e+00> : vector<8x128xf32>
    %75 = tpu.matmul %49, %42, %cst_25 {dimension_numbers = #tpu.dot_dimension_numbers<[1], [0], [0], [1], [0, 0, 1, 1], [], []>} : vector<8x32xf32>, vector<32x128xf32>, vector<8x128xf32> -> vector<8x128xf32>
    %76 = arith.addf %74, %75 : vector<8x128xf32>
    %77 = arith.mulf %8, %76 : vector<8x128xf32>
    %78 = arith.negf %77 : vector<8x128xf32>
    %79 = math.exp %78 : vector<8x128xf32>
    %cst_26 = arith.constant 1.000000e+00 : f32
    %80 = vector.broadcast %cst_26 : f32 to vector<8x128xf32>
    %81 = arith.addf %80, %79 : vector<8x128xf32>
    %82 = arith.divf %80, %81 : vector<8x128xf32>
    %83 = arith.mulf %8, %82 : vector<8x128xf32>
    %84 = arith.addf %83, %11 : vector<8x128xf32>
    %85 = vector.extract_strided_slice %84 {offsets = [0, 0], sizes = [8, 32], strides = [1, 1]} : vector<8x128xf32> to vector<8x32xf32>
    %86 = vector.extract_strided_slice %84 {offsets = [0, 32], sizes = [8, 32], strides = [1, 1]} : vector<8x128xf32> to vector<8x32xf32>
    %87 = vector.extract_strided_slice %84 {offsets = [0, 64], sizes = [8, 32], strides = [1, 1]} : vector<8x128xf32> to vector<8x32xf32>
    %88 = vector.extract_strided_slice %84 {offsets = [0, 96], sizes = [8, 32], strides = [1, 1]} : vector<8x128xf32> to vector<8x32xf32>
    %89 = arith.mulf %86, %51 : vector<8x32xf32>
    %90 = arith.mulf %85, %87 : vector<8x32xf32>
    %91 = arith.addf %89, %90 : vector<8x32xf32>
    %92 = math.tanh %91 : vector<8x32xf32>
    %93 = arith.mulf %88, %92 : vector<8x32xf32>
    %94 = vector.extract_strided_slice %47 {offsets = [8, 0], sizes = [8, 128], strides = [1, 1]} : vector<64x128xf32> to vector<8x128xf32>
    %cst_27 = arith.constant dense<0.000000e+00> : vector<8x128xf32>
    %95 = tpu.matmul %71, %41, %cst_27 {dimension_numbers = #tpu.dot_dimension_numbers<[1], [0], [0], [1], [0, 0, 1, 1], [], []>} : vector<8x32xf32>, vector<32x128xf32>, vector<8x128xf32> -> vector<8x128xf32>
    %96 = arith.addf %94, %95 : vector<8x128xf32>
    %97 = arith.mulf %8, %96 : vector<8x128xf32>
    %98 = arith.negf %97 : vector<8x128xf32>
    %99 = math.exp %98 : vector<8x128xf32>
    %cst_28 = arith.constant 1.000000e+00 : f32
    %100 = vector.broadcast %cst_28 : f32 to vector<8x128xf32>
    %101 = arith.addf %100, %99 : vector<8x128xf32>
    %102 = arith.divf %100, %101 : vector<8x128xf32>
    %103 = arith.mulf %8, %102 : vector<8x128xf32>
    %104 = arith.addf %103, %11 : vector<8x128xf32>
    %105 = vector.extract_strided_slice %104 {offsets = [0, 0], sizes = [8, 32], strides = [1, 1]} : vector<8x128xf32> to vector<8x32xf32>
    %106 = vector.extract_strided_slice %104 {offsets = [0, 32], sizes = [8, 32], strides = [1, 1]} : vector<8x128xf32> to vector<8x32xf32>
    %107 = vector.extract_strided_slice %104 {offsets = [0, 64], sizes = [8, 32], strides = [1, 1]} : vector<8x128xf32> to vector<8x32xf32>
    %108 = vector.extract_strided_slice %104 {offsets = [0, 96], sizes = [8, 32], strides = [1, 1]} : vector<8x128xf32> to vector<8x32xf32>
    %109 = arith.mulf %106, %69 : vector<8x32xf32>
    %110 = arith.mulf %105, %107 : vector<8x32xf32>
    %111 = arith.addf %109, %110 : vector<8x32xf32>
    %112 = math.tanh %111 : vector<8x32xf32>
    %113 = arith.mulf %108, %112 : vector<8x32xf32>
    %cst_29 = arith.constant dense<0.000000e+00> : vector<8x128xf32>
    %114 = tpu.matmul %113, %40, %cst_29 {dimension_numbers = #tpu.dot_dimension_numbers<[1], [0], [0], [1], [0, 0, 1, 1], [], []>} : vector<8x32xf32>, vector<32x128xf32>, vector<8x128xf32> -> vector<8x128xf32>
    %115 = vector.broadcast %44 : vector<1x128xf32> to vector<8x128xf32>
    %116 = arith.addf %114, %115 : vector<8x128xf32>
    %cst_30 = arith.constant dense<0.000000e+00> : vector<8x128xf32>
    %117 = tpu.matmul %93, %42, %cst_30 {dimension_numbers = #tpu.dot_dimension_numbers<[1], [0], [0], [1], [0, 0, 1, 1], [], []>} : vector<8x32xf32>, vector<32x128xf32>, vector<8x128xf32> -> vector<8x128xf32>
    %118 = arith.addf %116, %117 : vector<8x128xf32>
    %119 = arith.mulf %8, %118 : vector<8x128xf32>
    %120 = arith.negf %119 : vector<8x128xf32>
    %121 = math.exp %120 : vector<8x128xf32>
    %cst_31 = arith.constant 1.000000e+00 : f32
    %122 = vector.broadcast %cst_31 : f32 to vector<8x128xf32>
    %123 = arith.addf %122, %121 : vector<8x128xf32>
    %124 = arith.divf %122, %123 : vector<8x128xf32>
    %125 = arith.mulf %8, %124 : vector<8x128xf32>
    %126 = arith.addf %125, %11 : vector<8x128xf32>
    %127 = vector.extract_strided_slice %126 {offsets = [0, 0], sizes = [8, 32], strides = [1, 1]} : vector<8x128xf32> to vector<8x32xf32>
    %128 = vector.extract_strided_slice %126 {offsets = [0, 32], sizes = [8, 32], strides = [1, 1]} : vector<8x128xf32> to vector<8x32xf32>
    %129 = vector.extract_strided_slice %126 {offsets = [0, 64], sizes = [8, 32], strides = [1, 1]} : vector<8x128xf32> to vector<8x32xf32>
    %130 = vector.extract_strided_slice %126 {offsets = [0, 96], sizes = [8, 32], strides = [1, 1]} : vector<8x128xf32> to vector<8x32xf32>
    %131 = arith.mulf %128, %91 : vector<8x32xf32>
    %132 = arith.mulf %127, %129 : vector<8x32xf32>
    %133 = arith.addf %131, %132 : vector<8x32xf32>
    %134 = math.tanh %133 : vector<8x32xf32>
    %135 = arith.mulf %130, %134 : vector<8x32xf32>
    %136 = vector.extract_strided_slice %47 {offsets = [16, 0], sizes = [8, 128], strides = [1, 1]} : vector<64x128xf32> to vector<8x128xf32>
    %cst_32 = arith.constant dense<0.000000e+00> : vector<8x128xf32>
    %137 = tpu.matmul %113, %41, %cst_32 {dimension_numbers = #tpu.dot_dimension_numbers<[1], [0], [0], [1], [0, 0, 1, 1], [], []>} : vector<8x32xf32>, vector<32x128xf32>, vector<8x128xf32> -> vector<8x128xf32>
    %138 = arith.addf %136, %137 : vector<8x128xf32>
    %139 = arith.mulf %8, %138 : vector<8x128xf32>
    %140 = arith.negf %139 : vector<8x128xf32>
    %141 = math.exp %140 : vector<8x128xf32>
    %cst_33 = arith.constant 1.000000e+00 : f32
    %142 = vector.broadcast %cst_33 : f32 to vector<8x128xf32>
    %143 = arith.addf %142, %141 : vector<8x128xf32>
    %144 = arith.divf %142, %143 : vector<8x128xf32>
    %145 = arith.mulf %8, %144 : vector<8x128xf32>
    %146 = arith.addf %145, %11 : vector<8x128xf32>
    %147 = vector.extract_strided_slice %146 {offsets = [0, 0], sizes = [8, 32], strides = [1, 1]} : vector<8x128xf32> to vector<8x32xf32>
    %148 = vector.extract_strided_slice %146 {offsets = [0, 32], sizes = [8, 32], strides = [1, 1]} : vector<8x128xf32> to vector<8x32xf32>
    %149 = vector.extract_strided_slice %146 {offsets = [0, 64], sizes = [8, 32], strides = [1, 1]} : vector<8x128xf32> to vector<8x32xf32>
    %150 = vector.extract_strided_slice %146 {offsets = [0, 96], sizes = [8, 32], strides = [1, 1]} : vector<8x128xf32> to vector<8x32xf32>
    %151 = arith.mulf %148, %111 : vector<8x32xf32>
    %152 = arith.mulf %147, %149 : vector<8x32xf32>
    %153 = arith.addf %151, %152 : vector<8x32xf32>
    %154 = math.tanh %153 : vector<8x32xf32>
    %155 = arith.mulf %150, %154 : vector<8x32xf32>
    %cst_34 = arith.constant dense<0.000000e+00> : vector<8x128xf32>
    %156 = tpu.matmul %155, %40, %cst_34 {dimension_numbers = #tpu.dot_dimension_numbers<[1], [0], [0], [1], [0, 0, 1, 1], [], []>} : vector<8x32xf32>, vector<32x128xf32>, vector<8x128xf32> -> vector<8x128xf32>
    %157 = vector.broadcast %44 : vector<1x128xf32> to vector<8x128xf32>
    %158 = arith.addf %156, %157 : vector<8x128xf32>
    %cst_35 = arith.constant dense<0.000000e+00> : vector<8x128xf32>
    %159 = tpu.matmul %135, %42, %cst_35 {dimension_numbers = #tpu.dot_dimension_numbers<[1], [0], [0], [1], [0, 0, 1, 1], [], []>} : vector<8x32xf32>, vector<32x128xf32>, vector<8x128xf32> -> vector<8x128xf32>
    %160 = arith.addf %158, %159 : vector<8x128xf32>
    %161 = arith.mulf %8, %160 : vector<8x128xf32>
    %162 = arith.negf %161 : vector<8x128xf32>
    %163 = math.exp %162 : vector<8x128xf32>
    %cst_36 = arith.constant 1.000000e+00 : f32
    %164 = vector.broadcast %cst_36 : f32 to vector<8x128xf32>
    %165 = arith.addf %164, %163 : vector<8x128xf32>
    %166 = arith.divf %164, %165 : vector<8x128xf32>
    %167 = arith.mulf %8, %166 : vector<8x128xf32>
    %168 = arith.addf %167, %11 : vector<8x128xf32>
    %169 = vector.extract_strided_slice %168 {offsets = [0, 0], sizes = [8, 32], strides = [1, 1]} : vector<8x128xf32> to vector<8x32xf32>
    %170 = vector.extract_strided_slice %168 {offsets = [0, 32], sizes = [8, 32], strides = [1, 1]} : vector<8x128xf32> to vector<8x32xf32>
    %171 = vector.extract_strided_slice %168 {offsets = [0, 64], sizes = [8, 32], strides = [1, 1]} : vector<8x128xf32> to vector<8x32xf32>
    %172 = vector.extract_strided_slice %168 {offsets = [0, 96], sizes = [8, 32], strides = [1, 1]} : vector<8x128xf32> to vector<8x32xf32>
    %173 = arith.mulf %170, %133 : vector<8x32xf32>
    %174 = arith.mulf %169, %171 : vector<8x32xf32>
    %175 = arith.addf %173, %174 : vector<8x32xf32>
    %176 = math.tanh %175 : vector<8x32xf32>
    %177 = arith.mulf %172, %176 : vector<8x32xf32>
    %178 = vector.extract_strided_slice %47 {offsets = [24, 0], sizes = [8, 128], strides = [1, 1]} : vector<64x128xf32> to vector<8x128xf32>
    %cst_37 = arith.constant dense<0.000000e+00> : vector<8x128xf32>
    %179 = tpu.matmul %155, %41, %cst_37 {dimension_numbers = #tpu.dot_dimension_numbers<[1], [0], [0], [1], [0, 0, 1, 1], [], []>} : vector<8x32xf32>, vector<32x128xf32>, vector<8x128xf32> -> vector<8x128xf32>
    %180 = arith.addf %178, %179 : vector<8x128xf32>
    %181 = arith.mulf %8, %180 : vector<8x128xf32>
    %182 = arith.negf %181 : vector<8x128xf32>
    %183 = math.exp %182 : vector<8x128xf32>
    %cst_38 = arith.constant 1.000000e+00 : f32
    %184 = vector.broadcast %cst_38 : f32 to vector<8x128xf32>
    %185 = arith.addf %184, %183 : vector<8x128xf32>
    %186 = arith.divf %184, %185 : vector<8x128xf32>
    %187 = arith.mulf %8, %186 : vector<8x128xf32>
    %188 = arith.addf %187, %11 : vector<8x128xf32>
    %189 = vector.extract_strided_slice %188 {offsets = [0, 0], sizes = [8, 32], strides = [1, 1]} : vector<8x128xf32> to vector<8x32xf32>
    %190 = vector.extract_strided_slice %188 {offsets = [0, 32], sizes = [8, 32], strides = [1, 1]} : vector<8x128xf32> to vector<8x32xf32>
    %191 = vector.extract_strided_slice %188 {offsets = [0, 64], sizes = [8, 32], strides = [1, 1]} : vector<8x128xf32> to vector<8x32xf32>
    %192 = vector.extract_strided_slice %188 {offsets = [0, 96], sizes = [8, 32], strides = [1, 1]} : vector<8x128xf32> to vector<8x32xf32>
    %193 = arith.mulf %190, %153 : vector<8x32xf32>
    %194 = arith.mulf %189, %191 : vector<8x32xf32>
    %195 = arith.addf %193, %194 : vector<8x32xf32>
    %196 = math.tanh %195 : vector<8x32xf32>
    %197 = arith.mulf %192, %196 : vector<8x32xf32>
    %cst_39 = arith.constant dense<0.000000e+00> : vector<8x128xf32>
    %198 = tpu.matmul %197, %40, %cst_39 {dimension_numbers = #tpu.dot_dimension_numbers<[1], [0], [0], [1], [0, 0, 1, 1], [], []>} : vector<8x32xf32>, vector<32x128xf32>, vector<8x128xf32> -> vector<8x128xf32>
    %199 = vector.broadcast %44 : vector<1x128xf32> to vector<8x128xf32>
    %200 = arith.addf %198, %199 : vector<8x128xf32>
    %cst_40 = arith.constant dense<0.000000e+00> : vector<8x128xf32>
    %201 = tpu.matmul %177, %42, %cst_40 {dimension_numbers = #tpu.dot_dimension_numbers<[1], [0], [0], [1], [0, 0, 1, 1], [], []>} : vector<8x32xf32>, vector<32x128xf32>, vector<8x128xf32> -> vector<8x128xf32>
    %202 = arith.addf %200, %201 : vector<8x128xf32>
    %203 = arith.mulf %8, %202 : vector<8x128xf32>
    %204 = arith.negf %203 : vector<8x128xf32>
    %205 = math.exp %204 : vector<8x128xf32>
    %cst_41 = arith.constant 1.000000e+00 : f32
    %206 = vector.broadcast %cst_41 : f32 to vector<8x128xf32>
    %207 = arith.addf %206, %205 : vector<8x128xf32>
    %208 = arith.divf %206, %207 : vector<8x128xf32>
    %209 = arith.mulf %8, %208 : vector<8x128xf32>
    %210 = arith.addf %209, %11 : vector<8x128xf32>
    %211 = vector.extract_strided_slice %210 {offsets = [0, 0], sizes = [8, 32], strides = [1, 1]} : vector<8x128xf32> to vector<8x32xf32>
    %212 = vector.extract_strided_slice %210 {offsets = [0, 32], sizes = [8, 32], strides = [1, 1]} : vector<8x128xf32> to vector<8x32xf32>
    %213 = vector.extract_strided_slice %210 {offsets = [0, 64], sizes = [8, 32], strides = [1, 1]} : vector<8x128xf32> to vector<8x32xf32>
    %214 = vector.extract_strided_slice %210 {offsets = [0, 96], sizes = [8, 32], strides = [1, 1]} : vector<8x128xf32> to vector<8x32xf32>
    %215 = arith.mulf %212, %175 : vector<8x32xf32>
    %216 = arith.mulf %211, %213 : vector<8x32xf32>
    %217 = arith.addf %215, %216 : vector<8x32xf32>
    %218 = math.tanh %217 : vector<8x32xf32>
    %219 = arith.mulf %214, %218 : vector<8x32xf32>
    %220 = vector.extract_strided_slice %47 {offsets = [32, 0], sizes = [8, 128], strides = [1, 1]} : vector<64x128xf32> to vector<8x128xf32>
    %cst_42 = arith.constant dense<0.000000e+00> : vector<8x128xf32>
    %221 = tpu.matmul %197, %41, %cst_42 {dimension_numbers = #tpu.dot_dimension_numbers<[1], [0], [0], [1], [0, 0, 1, 1], [], []>} : vector<8x32xf32>, vector<32x128xf32>, vector<8x128xf32> -> vector<8x128xf32>
    %222 = arith.addf %220, %221 : vector<8x128xf32>
    %223 = arith.mulf %8, %222 : vector<8x128xf32>
    %224 = arith.negf %223 : vector<8x128xf32>
    %225 = math.exp %224 : vector<8x128xf32>
    %cst_43 = arith.constant 1.000000e+00 : f32
    %226 = vector.broadcast %cst_43 : f32 to vector<8x128xf32>
    %227 = arith.addf %226, %225 : vector<8x128xf32>
    %228 = arith.divf %226, %227 : vector<8x128xf32>
    %229 = arith.mulf %8, %228 : vector<8x128xf32>
    %230 = arith.addf %229, %11 : vector<8x128xf32>
    %231 = vector.extract_strided_slice %230 {offsets = [0, 0], sizes = [8, 32], strides = [1, 1]} : vector<8x128xf32> to vector<8x32xf32>
    %232 = vector.extract_strided_slice %230 {offsets = [0, 32], sizes = [8, 32], strides = [1, 1]} : vector<8x128xf32> to vector<8x32xf32>
    %233 = vector.extract_strided_slice %230 {offsets = [0, 64], sizes = [8, 32], strides = [1, 1]} : vector<8x128xf32> to vector<8x32xf32>
    %234 = vector.extract_strided_slice %230 {offsets = [0, 96], sizes = [8, 32], strides = [1, 1]} : vector<8x128xf32> to vector<8x32xf32>
    %235 = arith.mulf %232, %195 : vector<8x32xf32>
    %236 = arith.mulf %231, %233 : vector<8x32xf32>
    %237 = arith.addf %235, %236 : vector<8x32xf32>
    %238 = math.tanh %237 : vector<8x32xf32>
    %239 = arith.mulf %234, %238 : vector<8x32xf32>
    %cst_44 = arith.constant dense<0.000000e+00> : vector<8x128xf32>
    %240 = tpu.matmul %239, %40, %cst_44 {dimension_numbers = #tpu.dot_dimension_numbers<[1], [0], [0], [1], [0, 0, 1, 1], [], []>} : vector<8x32xf32>, vector<32x128xf32>, vector<8x128xf32> -> vector<8x128xf32>
    %241 = vector.broadcast %44 : vector<1x128xf32> to vector<8x128xf32>
    %242 = arith.addf %240, %241 : vector<8x128xf32>
    %cst_45 = arith.constant dense<0.000000e+00> : vector<8x128xf32>
    %243 = tpu.matmul %219, %42, %cst_45 {dimension_numbers = #tpu.dot_dimension_numbers<[1], [0], [0], [1], [0, 0, 1, 1], [], []>} : vector<8x32xf32>, vector<32x128xf32>, vector<8x128xf32> -> vector<8x128xf32>
    %244 = arith.addf %242, %243 : vector<8x128xf32>
    %245 = arith.mulf %8, %244 : vector<8x128xf32>
    %246 = arith.negf %245 : vector<8x128xf32>
    %247 = math.exp %246 : vector<8x128xf32>
    %cst_46 = arith.constant 1.000000e+00 : f32
    %248 = vector.broadcast %cst_46 : f32 to vector<8x128xf32>
    %249 = arith.addf %248, %247 : vector<8x128xf32>
    %250 = arith.divf %248, %249 : vector<8x128xf32>
    %251 = arith.mulf %8, %250 : vector<8x128xf32>
    %252 = arith.addf %251, %11 : vector<8x128xf32>
    %253 = vector.extract_strided_slice %252 {offsets = [0, 0], sizes = [8, 32], strides = [1, 1]} : vector<8x128xf32> to vector<8x32xf32>
    %254 = vector.extract_strided_slice %252 {offsets = [0, 32], sizes = [8, 32], strides = [1, 1]} : vector<8x128xf32> to vector<8x32xf32>
    %255 = vector.extract_strided_slice %252 {offsets = [0, 64], sizes = [8, 32], strides = [1, 1]} : vector<8x128xf32> to vector<8x32xf32>
    %256 = vector.extract_strided_slice %252 {offsets = [0, 96], sizes = [8, 32], strides = [1, 1]} : vector<8x128xf32> to vector<8x32xf32>
    %257 = arith.mulf %254, %217 : vector<8x32xf32>
    %258 = arith.mulf %253, %255 : vector<8x32xf32>
    %259 = arith.addf %257, %258 : vector<8x32xf32>
    %260 = math.tanh %259 : vector<8x32xf32>
    %261 = arith.mulf %256, %260 : vector<8x32xf32>
    %262 = vector.extract_strided_slice %47 {offsets = [40, 0], sizes = [8, 128], strides = [1, 1]} : vector<64x128xf32> to vector<8x128xf32>
    %cst_47 = arith.constant dense<0.000000e+00> : vector<8x128xf32>
    %263 = tpu.matmul %239, %41, %cst_47 {dimension_numbers = #tpu.dot_dimension_numbers<[1], [0], [0], [1], [0, 0, 1, 1], [], []>} : vector<8x32xf32>, vector<32x128xf32>, vector<8x128xf32> -> vector<8x128xf32>
    %264 = arith.addf %262, %263 : vector<8x128xf32>
    %265 = arith.mulf %8, %264 : vector<8x128xf32>
    %266 = arith.negf %265 : vector<8x128xf32>
    %267 = math.exp %266 : vector<8x128xf32>
    %cst_48 = arith.constant 1.000000e+00 : f32
    %268 = vector.broadcast %cst_48 : f32 to vector<8x128xf32>
    %269 = arith.addf %268, %267 : vector<8x128xf32>
    %270 = arith.divf %268, %269 : vector<8x128xf32>
    %271 = arith.mulf %8, %270 : vector<8x128xf32>
    %272 = arith.addf %271, %11 : vector<8x128xf32>
    %273 = vector.extract_strided_slice %272 {offsets = [0, 0], sizes = [8, 32], strides = [1, 1]} : vector<8x128xf32> to vector<8x32xf32>
    %274 = vector.extract_strided_slice %272 {offsets = [0, 32], sizes = [8, 32], strides = [1, 1]} : vector<8x128xf32> to vector<8x32xf32>
    %275 = vector.extract_strided_slice %272 {offsets = [0, 64], sizes = [8, 32], strides = [1, 1]} : vector<8x128xf32> to vector<8x32xf32>
    %276 = vector.extract_strided_slice %272 {offsets = [0, 96], sizes = [8, 32], strides = [1, 1]} : vector<8x128xf32> to vector<8x32xf32>
    %277 = arith.mulf %274, %237 : vector<8x32xf32>
    %278 = arith.mulf %273, %275 : vector<8x32xf32>
    %279 = arith.addf %277, %278 : vector<8x32xf32>
    %280 = math.tanh %279 : vector<8x32xf32>
    %281 = arith.mulf %276, %280 : vector<8x32xf32>
    %cst_49 = arith.constant dense<0.000000e+00> : vector<8x128xf32>
    %282 = tpu.matmul %281, %40, %cst_49 {dimension_numbers = #tpu.dot_dimension_numbers<[1], [0], [0], [1], [0, 0, 1, 1], [], []>} : vector<8x32xf32>, vector<32x128xf32>, vector<8x128xf32> -> vector<8x128xf32>
    %283 = vector.broadcast %44 : vector<1x128xf32> to vector<8x128xf32>
    %284 = arith.addf %282, %283 : vector<8x128xf32>
    %cst_50 = arith.constant dense<0.000000e+00> : vector<8x128xf32>
    %285 = tpu.matmul %261, %42, %cst_50 {dimension_numbers = #tpu.dot_dimension_numbers<[1], [0], [0], [1], [0, 0, 1, 1], [], []>} : vector<8x32xf32>, vector<32x128xf32>, vector<8x128xf32> -> vector<8x128xf32>
    %286 = arith.addf %284, %285 : vector<8x128xf32>
    %287 = arith.mulf %8, %286 : vector<8x128xf32>
    %288 = arith.negf %287 : vector<8x128xf32>
    %289 = math.exp %288 : vector<8x128xf32>
    %cst_51 = arith.constant 1.000000e+00 : f32
    %290 = vector.broadcast %cst_51 : f32 to vector<8x128xf32>
    %291 = arith.addf %290, %289 : vector<8x128xf32>
    %292 = arith.divf %290, %291 : vector<8x128xf32>
    %293 = arith.mulf %8, %292 : vector<8x128xf32>
    %294 = arith.addf %293, %11 : vector<8x128xf32>
    %295 = vector.extract_strided_slice %294 {offsets = [0, 0], sizes = [8, 32], strides = [1, 1]} : vector<8x128xf32> to vector<8x32xf32>
    %296 = vector.extract_strided_slice %294 {offsets = [0, 32], sizes = [8, 32], strides = [1, 1]} : vector<8x128xf32> to vector<8x32xf32>
    %297 = vector.extract_strided_slice %294 {offsets = [0, 64], sizes = [8, 32], strides = [1, 1]} : vector<8x128xf32> to vector<8x32xf32>
    %298 = vector.extract_strided_slice %294 {offsets = [0, 96], sizes = [8, 32], strides = [1, 1]} : vector<8x128xf32> to vector<8x32xf32>
    %299 = arith.mulf %296, %259 : vector<8x32xf32>
    %300 = arith.mulf %295, %297 : vector<8x32xf32>
    %301 = arith.addf %299, %300 : vector<8x32xf32>
    %302 = math.tanh %301 : vector<8x32xf32>
    %303 = arith.mulf %298, %302 : vector<8x32xf32>
    %304 = vector.extract_strided_slice %47 {offsets = [48, 0], sizes = [8, 128], strides = [1, 1]} : vector<64x128xf32> to vector<8x128xf32>
    %cst_52 = arith.constant dense<0.000000e+00> : vector<8x128xf32>
    %305 = tpu.matmul %281, %41, %cst_52 {dimension_numbers = #tpu.dot_dimension_numbers<[1], [0], [0], [1], [0, 0, 1, 1], [], []>} : vector<8x32xf32>, vector<32x128xf32>, vector<8x128xf32> -> vector<8x128xf32>
    %306 = arith.addf %304, %305 : vector<8x128xf32>
    %307 = arith.mulf %8, %306 : vector<8x128xf32>
    %308 = arith.negf %307 : vector<8x128xf32>
    %309 = math.exp %308 : vector<8x128xf32>
    %cst_53 = arith.constant 1.000000e+00 : f32
    %310 = vector.broadcast %cst_53 : f32 to vector<8x128xf32>
    %311 = arith.addf %310, %309 : vector<8x128xf32>
    %312 = arith.divf %310, %311 : vector<8x128xf32>
    %313 = arith.mulf %8, %312 : vector<8x128xf32>
    %314 = arith.addf %313, %11 : vector<8x128xf32>
    %315 = vector.extract_strided_slice %314 {offsets = [0, 0], sizes = [8, 32], strides = [1, 1]} : vector<8x128xf32> to vector<8x32xf32>
    %316 = vector.extract_strided_slice %314 {offsets = [0, 32], sizes = [8, 32], strides = [1, 1]} : vector<8x128xf32> to vector<8x32xf32>
    %317 = vector.extract_strided_slice %314 {offsets = [0, 64], sizes = [8, 32], strides = [1, 1]} : vector<8x128xf32> to vector<8x32xf32>
    %318 = vector.extract_strided_slice %314 {offsets = [0, 96], sizes = [8, 32], strides = [1, 1]} : vector<8x128xf32> to vector<8x32xf32>
    %319 = arith.mulf %316, %279 : vector<8x32xf32>
    %320 = arith.mulf %315, %317 : vector<8x32xf32>
    %321 = arith.addf %319, %320 : vector<8x32xf32>
    %322 = math.tanh %321 : vector<8x32xf32>
    %323 = arith.mulf %318, %322 : vector<8x32xf32>
    %cst_54 = arith.constant dense<0.000000e+00> : vector<8x128xf32>
    %324 = tpu.matmul %323, %40, %cst_54 {dimension_numbers = #tpu.dot_dimension_numbers<[1], [0], [0], [1], [0, 0, 1, 1], [], []>} : vector<8x32xf32>, vector<32x128xf32>, vector<8x128xf32> -> vector<8x128xf32>
    %325 = vector.broadcast %44 : vector<1x128xf32> to vector<8x128xf32>
    %326 = arith.addf %324, %325 : vector<8x128xf32>
    %cst_55 = arith.constant dense<0.000000e+00> : vector<8x128xf32>
    %327 = tpu.matmul %303, %42, %cst_55 {dimension_numbers = #tpu.dot_dimension_numbers<[1], [0], [0], [1], [0, 0, 1, 1], [], []>} : vector<8x32xf32>, vector<32x128xf32>, vector<8x128xf32> -> vector<8x128xf32>
    %328 = arith.addf %326, %327 : vector<8x128xf32>
    %329 = arith.mulf %8, %328 : vector<8x128xf32>
    %330 = arith.negf %329 : vector<8x128xf32>
    %331 = math.exp %330 : vector<8x128xf32>
    %cst_56 = arith.constant 1.000000e+00 : f32
    %332 = vector.broadcast %cst_56 : f32 to vector<8x128xf32>
    %333 = arith.addf %332, %331 : vector<8x128xf32>
    %334 = arith.divf %332, %333 : vector<8x128xf32>
    %335 = arith.mulf %8, %334 : vector<8x128xf32>
    %336 = arith.addf %335, %11 : vector<8x128xf32>
    %337 = vector.extract_strided_slice %336 {offsets = [0, 0], sizes = [8, 32], strides = [1, 1]} : vector<8x128xf32> to vector<8x32xf32>
    %338 = vector.extract_strided_slice %336 {offsets = [0, 32], sizes = [8, 32], strides = [1, 1]} : vector<8x128xf32> to vector<8x32xf32>
    %339 = vector.extract_strided_slice %336 {offsets = [0, 64], sizes = [8, 32], strides = [1, 1]} : vector<8x128xf32> to vector<8x32xf32>
    %340 = vector.extract_strided_slice %336 {offsets = [0, 96], sizes = [8, 32], strides = [1, 1]} : vector<8x128xf32> to vector<8x32xf32>
    %341 = arith.mulf %338, %301 : vector<8x32xf32>
    %342 = arith.mulf %337, %339 : vector<8x32xf32>
    %343 = arith.addf %341, %342 : vector<8x32xf32>
    %344 = math.tanh %343 : vector<8x32xf32>
    %345 = arith.mulf %340, %344 : vector<8x32xf32>
    %346 = vector.extract_strided_slice %47 {offsets = [56, 0], sizes = [8, 128], strides = [1, 1]} : vector<64x128xf32> to vector<8x128xf32>
    %cst_57 = arith.constant dense<0.000000e+00> : vector<8x128xf32>
    %347 = tpu.matmul %323, %41, %cst_57 {dimension_numbers = #tpu.dot_dimension_numbers<[1], [0], [0], [1], [0, 0, 1, 1], [], []>} : vector<8x32xf32>, vector<32x128xf32>, vector<8x128xf32> -> vector<8x128xf32>
    %348 = arith.addf %346, %347 : vector<8x128xf32>
    %349 = arith.mulf %8, %348 : vector<8x128xf32>
    %350 = arith.negf %349 : vector<8x128xf32>
    %351 = math.exp %350 : vector<8x128xf32>
    %cst_58 = arith.constant 1.000000e+00 : f32
    %352 = vector.broadcast %cst_58 : f32 to vector<8x128xf32>
    %353 = arith.addf %352, %351 : vector<8x128xf32>
    %354 = arith.divf %352, %353 : vector<8x128xf32>
    %355 = arith.mulf %8, %354 : vector<8x128xf32>
    %356 = arith.addf %355, %11 : vector<8x128xf32>
    %357 = vector.extract_strided_slice %356 {offsets = [0, 0], sizes = [8, 32], strides = [1, 1]} : vector<8x128xf32> to vector<8x32xf32>
    %358 = vector.extract_strided_slice %356 {offsets = [0, 32], sizes = [8, 32], strides = [1, 1]} : vector<8x128xf32> to vector<8x32xf32>
    %359 = vector.extract_strided_slice %356 {offsets = [0, 64], sizes = [8, 32], strides = [1, 1]} : vector<8x128xf32> to vector<8x32xf32>
    %360 = vector.extract_strided_slice %356 {offsets = [0, 96], sizes = [8, 32], strides = [1, 1]} : vector<8x128xf32> to vector<8x32xf32>
    %361 = arith.mulf %358, %321 : vector<8x32xf32>
    %362 = arith.mulf %357, %359 : vector<8x32xf32>
    %363 = arith.addf %361, %362 : vector<8x32xf32>
    %364 = math.tanh %363 : vector<8x32xf32>
    %365 = arith.mulf %360, %364 : vector<8x32xf32>
    %cst_59 = arith.constant dense<0.000000e+00> : vector<8x128xf32>
    %366 = tpu.matmul %365, %40, %cst_59 {dimension_numbers = #tpu.dot_dimension_numbers<[1], [0], [0], [1], [0, 0, 1, 1], [], []>} : vector<8x32xf32>, vector<32x128xf32>, vector<8x128xf32> -> vector<8x128xf32>
    %367 = vector.broadcast %44 : vector<1x128xf32> to vector<8x128xf32>
    %368 = arith.addf %366, %367 : vector<8x128xf32>
    %cst_60 = arith.constant dense<0.000000e+00> : vector<8x128xf32>
    %369 = tpu.matmul %345, %42, %cst_60 {dimension_numbers = #tpu.dot_dimension_numbers<[1], [0], [0], [1], [0, 0, 1, 1], [], []>} : vector<8x32xf32>, vector<32x128xf32>, vector<8x128xf32> -> vector<8x128xf32>
    %370 = arith.addf %368, %369 : vector<8x128xf32>
    %371 = arith.mulf %8, %370 : vector<8x128xf32>
    %372 = arith.negf %371 : vector<8x128xf32>
    %373 = math.exp %372 : vector<8x128xf32>
    %cst_61 = arith.constant 1.000000e+00 : f32
    %374 = vector.broadcast %cst_61 : f32 to vector<8x128xf32>
    %375 = arith.addf %374, %373 : vector<8x128xf32>
    %376 = arith.divf %374, %375 : vector<8x128xf32>
    %377 = arith.mulf %8, %376 : vector<8x128xf32>
    %378 = arith.addf %377, %11 : vector<8x128xf32>
    %379 = vector.extract_strided_slice %378 {offsets = [0, 0], sizes = [8, 32], strides = [1, 1]} : vector<8x128xf32> to vector<8x32xf32>
    %380 = vector.extract_strided_slice %378 {offsets = [0, 32], sizes = [8, 32], strides = [1, 1]} : vector<8x128xf32> to vector<8x32xf32>
    %381 = vector.extract_strided_slice %378 {offsets = [0, 64], sizes = [8, 32], strides = [1, 1]} : vector<8x128xf32> to vector<8x32xf32>
    %382 = vector.extract_strided_slice %378 {offsets = [0, 96], sizes = [8, 32], strides = [1, 1]} : vector<8x128xf32> to vector<8x32xf32>
    %383 = arith.mulf %380, %343 : vector<8x32xf32>
    %384 = arith.mulf %379, %381 : vector<8x32xf32>
    %385 = arith.addf %383, %384 : vector<8x32xf32>
    %386 = math.tanh %385 : vector<8x32xf32>
    %387 = arith.mulf %382, %386 : vector<8x32xf32>
    %c0_62 = arith.constant 0 : index
    %c0_63 = arith.constant 0 : index
    %388 = vector.load %arg7[%c0_62, %c0_63] : memref<32x16xf32, #tpu.memory_space<vmem>>, vector<32x16xf32>
    %cst_64 = arith.constant dense<0.000000e+00> : vector<8x16xf32>
    %389 = tpu.matmul %387, %388, %cst_64 {dimension_numbers = #tpu.dot_dimension_numbers<[1], [0], [0], [1], [0, 0, 1, 1], [], []>} : vector<8x32xf32>, vector<32x16xf32>, vector<8x16xf32> -> vector<8x16xf32>
    %c0_65 = arith.constant 0 : index
    %c0_66 = arith.constant 0 : index
    %390 = vector.load %arg8[%c0_65, %c0_66] : memref<1x16xf32, #tpu.memory_space<vmem>>, vector<1x16xf32>
    %391 = vector.broadcast %390 : vector<1x16xf32> to vector<8x16xf32>
    %392 = arith.addf %389, %391 : vector<8x16xf32>
    %393 = vector.extract_strided_slice %392 {offsets = [0, 0], sizes = [2, 16], strides = [1, 1]} : vector<8x16xf32> to vector<2x16xf32>
    %c0_67 = arith.constant 0 : index
    %c0_68 = arith.constant 0 : index
    %394 = vector.load %arg9[%c0_67, %c0_68] : memref<2x16xf32, #tpu.memory_space<vmem>>, vector<2x16xf32>
    tpu.vector_store %arg9[%c0_67, %c0_68], %393 {strides = array<i32>} : memref<2x16xf32, #tpu.memory_space<vmem>>, vector<2x16xf32>,
    return
  }
}

</mosaic_0001>

<bundles_post_ra>
// kernel: lstm_branch_forward.1
= control target key start
LH: loop header
LB: loop body
LE: loop exit
PB: predicated region body
PF: predicated region fallthrough
CT: control target
= control target key end

     0   :  { %s2202_s0 = inlined_call_operand.vmem [shape: f32[16,64], index: 0, kind: input, shape index: {}]   ;;  %s2203_s1 = inlined_call_operand.vmem [shape: f32[64,128], index: 1, kind: input, shape index: {}]   ;;  %s2204_s2 = inlined_call_operand.vmem [shape: f32[32,128], index: 2, kind: input, shape index: {}]   ;;  %s2205_s3 = inlined_call_operand.vmem [shape: f32[1,128], index: 3, kind: input, shape index: {}]   ;;  %s2206_s4 = inlined_call_operand.vmem [shape: f32[32,128], index: 4, kind: input, shape index: {}]   ;;  %s2207_s5 = inlined_call_operand.vmem [shape: f32[32,128], index: 5, kind: input, shape index: {}]   ;;  %s2208_s6 = inlined_call_operand.vmem [shape: f32[1,128], index: 6, kind: input, shape index: {}]   ;;  %s2209_s7 = inlined_call_operand.vmem [shape: f32[32,16], index: 7, kind: input, shape index: {}]   ;;  %s2210_s8 = inlined_call_operand.vmem [shape: f32[1,16], index: 8, kind: input, shape index: {}]   ;;  %s2211_s9 = inlined_call_operand.hbm [shape: f32[2,16], index: 9, kind: output, shape index: {}]  }
   0x1   :  { %v97_v0 = vld [vmem:[%s2203_s1 + $0x38] sm:$0xff]  ;;  %v96_v1 = vld [vmem:[%s2203_s1 + $0x30] sm:$0xff]  ;;  %v95_v2 = vld [vmem:[%s2203_s1 + $0x28] sm:$0xff] }
   0x2   :  { %148 = vmatpush.msra.mxu0 %v97_v0  ;;  %v1694_v3 = vld [vmem:[%s2204_s2 + $0x18] sm:$0xff]  ;;  %v1699_v4 = vld [vmem:[%s2204_s2 + $0x10] sm:$0xff]  ;;  %v94_v5 = vld [vmem:[%s2203_s1 + $0x20] sm:$0xff] }
   0x3   :  { %197 = vmatpush.msra.mxu1 %v1694_v3  ;;  %v1708_v6 = vld [vmem:[%s2204_s2 + $0x8] sm:$0xff]  ;;  %v93_v8 = vld [vmem:[%s2203_s1 + $0x18] sm:$0xff]  ;;  %v1723_v10 = vld [vmem:[%s2204_s2] sm:$0xff] }
   0x4   :  { %149 = vmatpush.msra.mxu0 %v96_v1  ;;  %v1713_v7 = vld [vmem:[%s2202_s0 + $0x8] sm:$0xff] }
   0x5   :  { %198 = vmatpush.msra.mxu1 %v1699_v4  ;;  %v43_v9 = vrot.slane %v1713_v7, 7 }
   0x6   :  { %150 = vmatpush.msra.mxu0 %v95_v2 }
   0x7   :  { %14 = vsyncpa [#allocation3], 0  ;;  %199 = vmatpush.msra.mxu1 %v1708_v6  ;;  %v1729_v11 = vld [vmem:[%s2202_s0] sm:$0xff]  ;;  %vm45_vm0 = vcmask 1040384   ;;  %v92_v12 = vld [vmem:[%s2203_s1 + $0x10] sm:$0xff]  ;;  %vm47_vm1 = vcmask 1041408   ;;  %v33_v18 = vlaneseq }
   0x8   :  { %151 = vmatpush.msra.mxu0 %v94_v5  ;;  %v91_v13 = vld [vmem:[%s2203_s1 + $0x8] sm:$0xff]  ;;  %v46_v14 = vsel %vm45_vm0, %v1729_v11, %v43_v9  ;;  %v1627_v15 = vmov 0.0   ;;  %v90_v16 = vld [vmem:[%s2203_s1] sm:$0xff]  ;;  %vm115_vm2 = vcmask 523264   ;;  %v1628_v25 = vmov 1.0   ;;  %s1629_s17 = smov 64  }
   0x9   :  { %200 = vmatpush.msra.mxu1 %v1723_v10  ;;  %v48_v17 = vsel %vm47_vm1, %v46_v14, 0.0  ;;  %v34_v19 = vand.u32 127, %v33_v18  ;;  %v1757_v20 = vld [vmem:[%s2205_s3] ss:$0 sm:$0xff]  ;;  %s1630_s18 = smov 32   ;;  %v1785_v51 = vld [vmem:[%s2206_s4 + $0x18] sm:$0xff] }
   0xa   :  { %152 = vmatpush.msra.mxu0 %v93_v8  ;;  %201 = vmatmul.f32.vlgmr.msra.gmra.mxu1 %v1627_v15  ;;  %v1790_v52 = vld [vmem:[%s2206_s4 + $0x10] sm:$0xff]  ;;  %v1795_v53 = vld [vmem:[%s2207_s5 + $0x18] sm:$0xff]  ;;  %v50_v54 = vrot.slane %v1729_v11, 1  ;;  %v1808_v56 = vld [vmem:[%s2206_s4 + $0x8] sm:$0xff]  ;;  %vm181_vm10 = vcmask 261120   ;;  %s1631_s30 = smov [#allocation2]  }
   0xb   :  { %345 = vmatpush.msrb.mxu1 %v1694_v3  ;;  %vm35_vm3 = vcmp.ge.s32.totalorder %v34_v19, 64  ;;  %vm36_vm4 = vcmp.lt.s32.totalorder %v34_v19, 96  ;;  %265 = vmatpush.msra.mxu2 %v1785_v51  ;;  %v1803_v55 = vld [vmem:[%s2207_s5 + $0x10] sm:$0xff]  ;;  %v1815_v58 = vld [vmem:[%s2207_s5 + $0x8] sm:$0xff]  ;;  %v1824_v60 = vld [vmem:[%s2206_s4] sm:$0xff]  ;;  %s1423_s10 = sshll.u32 %s1631_s30, 4  ;;  %s1424_s10 = int_to_ptr.vmem [resolvable:$true] %s1423_s10 }
   0xc   :  { %153 = vmatpush.msra.mxu0 %v92_v12  ;;  %vm1759_vm5 = vmand %vm35_vm3, %vm36_vm4  ;;  %285 = vmatpush.msra.mxu3 %v1795_v53  ;;  %v52_v57 = vsel %vm45_vm0, %v50_v54, %v1713_v7  ;;  %v1837_v63 = vld [vmem:[%s2207_s5] sm:$0xff]  ;;  %s1425_s13 = sshll.u32 %s2211_s9, 4  ;;  %s1426_s13 = int_to_ptr.hbm [resolvable:$true] %s1425_s13 }
   0xd   :  { %346 = vmatpush.msrb.mxu1 %v1699_v4  ;;  %v1766_v26 = vsel %vm1759_vm5, 2.0, %v1628_v25  ;;  %v1772_v41 = vsel %vm1759_vm5, -1.0, %v1627_v15  ;;  %266 = vmatpush.msra.mxu2 %v1790_v52  ;;  %v53_v59 = vsel %vm47_vm1, %v52_v57, 0.0  ;;  %v1864_v12 = vld [vmem:[%s2208_s6] ss:$0 sm:$0xff] }
   0xe   :  { %154 = vmatpush.msra.mxu0 %v91_v13  ;;  %286 = vmatpush.msra.mxu3 %v1803_v55 }
   0xf   :  { %347 = vmatpush.msrb.mxu1 %v1708_v6  ;;  %267 = vmatpush.msra.mxu2 %v1808_v56 }
  0x10   :  { %155 = vmatpush.msra.mxu0 %v90_v16  ;;  %287 = vmatpush.msra.mxu3 %v1815_v58 }
  0x11   :  { %1434 = vmatmul.msk.f32.vlgmr.msra.gmra.mxu0 %vm115_vm2, %v48_v17  ;;  %348 = vmatpush.msrb.mxu1 %v1723_v10 }
  0x12   :  { %268 = vmatpush.msra.mxu2 %v1824_v60  ;;  %288 = vmatpush.msra.mxu3 %v1837_v63 }
  0x13   :  { %495 = vmatpush.msra.mxu1 %v1694_v3  ;;  %289 = vmatmul.f32.vlgmr.msra.gmra.mxu3 %v1627_v15 }
  0x14   :  { %410 = vmatpush.msrb.mxu2 %v1785_v51  ;;  %435 = vmatpush.msrb.mxu3 %v1795_v53 }
  0x15   :  { %496 = vmatpush.msra.mxu1 %v1699_v4 }
  0x16   :  { %411 = vmatpush.msrb.mxu2 %v1790_v52  ;;  %436 = vmatpush.msrb.mxu3 %v1803_v55 }
  0x17   :  { %497 = vmatpush.msra.mxu1 %v1708_v6 }
  0x18   :  { %412 = vmatpush.msrb.mxu2 %v1808_v56  ;;  %437 = vmatpush.msrb.mxu3 %v1815_v58 }
  0x19   :  { %498 = vmatpush.msra.mxu1 %v1723_v10  ;;  %1435 = vmatmul.msk.f32.gmra.mxu0 %vm115_vm2, %v53_v59 }
  0x1a   :  { %413 = vmatpush.msrb.mxu2 %v1824_v60  ;;  %438 = vmatpush.msrb.mxu3 %v1837_v63 }
  0x1c   :  { %585 = vmatpush.msra.mxu3 %v1795_v53 }
  0x1e   :  { %586 = vmatpush.msra.mxu3 %v1803_v55 }
  0x20   :  { %587 = vmatpush.msra.mxu3 %v1815_v58 }
  0x22   :  { %588 = vmatpush.msra.mxu3 %v1837_v63 }
  0x87   :  { %v202_v23 = vpop.f32.mrf.mxu1 }
  0x8e   :  { %v157_v22 = vpop.f32.mrf.mxu0 }
  0x8f   :  { %v158_v24 = vadd.f32 %v1757_v20, %v157_v22 }
  0x91   :  { %v205_v27 = vadd.f32 %v202_v23, %v158_v24 }
  0x93   :  { %v206_v28 = vmul.f32 %v205_v27, %v1766_v26 }
  0x95   :  { %v1442_v29 = vmul.f32 -1.442695, %v206_v28 }
  0x96   :  { %v160_v1 = vpop.f32.mrf.mxu0  ;;  %v290_v15 = vpop.f32.mrf.mxu3 }
  0x97   :  { %1489 = vpow2.f32 %v1442_v29  ;;  %v161_v2 = vadd.f32 %v1757_v20, %v160_v1 }
  0x9d   :  { %v1490_v30 = vpop.eup %1489 }
  0x9e   :  { %v210_v31 = vadd.f32 1.0, %v1490_v30 }
  0xa0   :  { %1491 = vrcp.f32 %v210_v31  ;;  %v222_v35 = vand.u32 2147483648, %v210_v31  ;;  %v220_v37 = vand.u32 2147483647, %v210_v31  ;;  %vm216_vm7 = vweird.f32 %v210_v31 }
  0xa2   :  { %v223_v39 = vor.u32 1.1754944e-38, %v222_v35  ;;  %vm221_vm9 = vcmp.eq.f32.partialorder %v220_v37, 8.507059e+37 }
  0xa6   :  { %v1492_v32 = vpop.eup %1491 }
  0xa7   :  { %v212_v33 = vmul.f32 %v1492_v32, %v210_v31  ;;  %vm217_vm6 = vweird.f32 %v1492_v32 }
  0xa8   :  { %vm218_vm8 = vmor %vm216_vm7, %vm217_vm6 }
  0xa9   :  { %v213_v34 = vsub.f32 1.0, %v212_v33 }
  0xab   :  { %v214_v36 = vmul.f32 %v1492_v32, %v213_v34 }
  0xad   :  { %v215_v38 = vadd.f32 %v1492_v32, %v214_v36 }
  0xaf   :  { %v219_v40 = vsel %vm218_vm8, %v1492_v32, %v215_v38 }
  0xb0   :  { %v224_v42 = vsel %vm221_vm9, %v223_v39, %v219_v40 }
  0xb1   :  { %v226_v43 = vmul.f32 %v224_v42, %v1766_v26 }
  0xb3   :  { %v227_v44 = vadd.f32 %v226_v43, %v1772_v41 }
  0xb5   :  { %230 = vrot.lane.b32.xlu0 %v227_v44, %s1629_s17  ;;  %v228_v47 = vmul.f32 0.0, %v227_v44 }
 0x127   :  { %v231_v45 = vpop.permute.xlu0 %230 }
 0x128   :  { %v233_v46 = vmul.f32 %v231_v45, %v227_v44 }
 0x12a   :  { %235 = vrot.lane.b32.xlu0 %v233_v46, %s1630_s18 }
 0x19c   :  { %v236_v48 = vpop.permute.xlu0 %235 }
 0x19d   :  { %v1778_v49 = vadd.f32 %v236_v48, %v228_v47 }
 0x19f   :  { %1493 = vtanh.f32 %v1778_v49 }
 0x1a5   :  { %v1494_v50 = vpop.eup %1493 }
 0x1a6   :  { %241 = vrot.lane.b32.xlu1 %v1494_v50, %s1629_s17 }
 0x218   :  { %v242_v61 = vpop.permute.xlu1 %241 }
 0x219   :  { %v244_v62 = vmul.f32 %v242_v61, %v227_v44 }
 0x21b   :  { %249 = vrot.lane.b32.xlu1 %v244_v62, %s1630_s18 }
 0x28d   :  { %v250_v0 = vpop.permute.xlu1 %249 }
 0x28e   :  { %1443 = vmatmul.msk.f32.vlgmr.msra.gmra.mxu2 %vm181_vm10, %v250_v0  ;;  %1445 = vmatmul.msk.f32.vlgmr.msrb.gmra.mxu1 %vm181_vm10, %v250_v0 }
 0x28f   :  { %560 = vmatpush.msra.mxu2 %v1785_v51  ;;  %645 = vmatpush.msrb.mxu1 %v1694_v3 }
 0x291   :  { %561 = vmatpush.msra.mxu2 %v1790_v52  ;;  %646 = vmatpush.msrb.mxu1 %v1699_v4 }
 0x293   :  { %562 = vmatpush.msra.mxu2 %v1808_v56  ;;  %647 = vmatpush.msrb.mxu1 %v1708_v6 }
 0x295   :  { %563 = vmatpush.msra.mxu2 %v1824_v60  ;;  %648 = vmatpush.msrb.mxu1 %v1723_v10 }
 0x30b   :  { %v350_v5 = vpop.f32.mrf.mxu1 }
 0x30c   :  { %v353_v8 = vadd.f32 %v350_v5, %v161_v2 }
 0x30e   :  { %v354_v9 = vmul.f32 %v353_v8, %v1766_v26 }
 0x310   :  { %v1446_v13 = vmul.f32 -1.442695, %v354_v9 }
 0x311   :  { %v270_v14 = vpop.f32.mrf.mxu2 }
 0x312   :  { %1495 = vpow2.f32 %v1446_v13  ;;  %v271_v16 = vadd.f32 %v1864_v12, %v270_v14 }
 0x314   :  { %v293_v17 = vadd.f32 %v290_v15, %v271_v16 }
 0x316   :  { %v294_v18 = vmul.f32 %v293_v17, %v1766_v26  ;;  %v56_v17 = vrot.slane %v1713_v7, 1 }
 0x318   :  { %v1496_v19 = vpop.eup %1495  ;;  %v1444_v21 = vmul.f32 -1.442695, %v294_v18 }
 0x319   :  { %v358_v22 = vadd.f32 1.0, %v1496_v19 }
 0x31a   :  { %1497 = vpow2.f32 %v1444_v21 }
 0x31b   :  { %1499 = vrcp.f32 %v358_v22  ;;  %v370_v29 = vand.u32 2147483648, %v358_v22  ;;  %v368_v31 = vand.u32 2147483647, %v358_v22  ;;  %vm364_vm12 = vweird.f32 %v358_v22 }
 0x31d   :  { %v371_v34 = vor.u32 1.1754944e-38, %v370_v29  ;;  %vm369_vm14 = vcmp.eq.f32.partialorder %v368_v31, 8.507059e+37 }
 0x320   :  { %v1498_v23 = vpop.eup %1497 }
 0x321   :  { %v1500_v24 = vpop.eup %1499  ;;  %v298_v25 = vadd.f32 1.0, %v1498_v23 }
 0x322   :  { %v360_v27 = vmul.f32 %v1500_v24, %v358_v22  ;;  %vm365_vm11 = vweird.f32 %v1500_v24 }
 0x323   :  { %1501 = vrcp.f32 %v298_v25  ;;  %vm366_vm13 = vmor %vm364_vm12, %vm365_vm11  ;;  %v310_v40 = vand.u32 2147483648, %v298_v25  ;;  %v308_v44 = vand.u32 2147483647, %v298_v25  ;;  %vm304_vm3 = vweird.f32 %v298_v25 }
 0x324   :  { %v361_v28 = vsub.f32 1.0, %v360_v27 }
 0x325   :  { %v311_v46 = vor.u32 1.1754944e-38, %v310_v40  ;;  %vm309_vm5 = vcmp.eq.f32.partialorder %v308_v44, 8.507059e+37 }
 0x326   :  { %v362_v30 = vmul.f32 %v1500_v24, %v361_v28 }
 0x328   :  { %v363_v32 = vadd.f32 %v1500_v24, %v362_v30 }
 0x329   :  { %v1502_v33 = vpop.eup %1501 }
 0x32a   :  { %v300_v35 = vmul.f32 %v1502_v33, %v298_v25  ;;  %v367_v36 = vsel %vm366_vm13, %v1500_v24, %v363_v32  ;;  %vm305_vm15 = vweird.f32 %v1502_v33 }
 0x32b   :  { %v372_v37 = vsel %vm369_vm14, %v371_v34, %v367_v36  ;;  %vm306_vm4 = vmor %vm304_vm3, %vm305_vm15 }
 0x32c   :  { %v301_v38 = vsub.f32 1.0, %v300_v35  ;;  %v374_v39 = vmul.f32 %v372_v37, %v1766_v26 }
 0x32e   :  { %v375_v42 = vadd.f32 %v374_v39, %v1772_v41  ;;  %v302_v43 = vmul.f32 %v1502_v33, %v301_v38 }
 0x330   :  { %378 = vrot.lane.b32.xlu2 %v375_v42, %s1629_s17  ;;  %v303_v45 = vadd.f32 %v1502_v33, %v302_v43  ;;  %v376_v0 = vmul.f32 %v375_v42, %v1778_v49  ;;  %v54_v49 = vrot.slane %v1729_v11, 2 }
 0x332   :  { %v307_v47 = vsel %vm306_vm4, %v1502_v33, %v303_v45  ;;  %v58_v18 = vsel %vm45_vm0, %v54_v49, %v56_v17 }
 0x333   :  { %v312_v48 = vsel %vm309_vm5, %v311_v46, %v307_v47  ;;  %v59_v19 = vsel %vm47_vm1, %v58_v18, 0.0 }
 0x334   :  { %v314_v50 = vmul.f32 %v312_v48, %v1766_v26  ;;  %1436 = vmatmul.msk.f32.gmra.mxu0 %vm115_vm2, %v59_v19 }
 0x336   :  { %v315_v54 = vadd.f32 %v314_v50, %v1772_v41 }
 0x338   :  { %318 = vrot.lane.b32.xlu2 %v315_v54, %s1629_s17  ;;  %v316_v5 = vmul.f32 0.0, %v315_v54 }
 0x38a   :  { %v379_v57 = vpop.permute.xlu2 %378 }
 0x38b   :  { %v381_v59 = vmul.f32 %v379_v57, %v375_v42 }
 0x38d   :  { %383 = vrot.lane.b32.xlu0 %v381_v59, %s1630_s18 }
 0x392   :  { %v319_v61 = vpop.permute.xlu2 %318 }
 0x393   :  { %v321_v62 = vmul.f32 %v319_v61, %v315_v54 }
 0x395   :  { %323 = vrot.lane.b32.xlu1 %v321_v62, %s1630_s18 }
 0x3b1   :  { %v163_v25 = vpop.f32.mrf.mxu0 }
 0x3b2   :  { %v164_v27 = vadd.f32 %v1757_v20, %v163_v25 }
 0x3ff   :  { %v384_v1 = vpop.permute.xlu0 %383 }
 0x400   :  { %v1877_v2 = vadd.f32 %v384_v1, %v376_v0 }
 0x402   :  { %1503 = vtanh.f32 %v1877_v2 }
 0x407   :  { %v324_v8 = vpop.permute.xlu1 %323 }
 0x408   :  { %v1504_v9 = vpop.eup %1503  ;;  %v1880_v13 = vadd.f32 %v324_v8, %v316_v5 }
 0x409   :  { %389 = vrot.lane.b32.xlu2 %v1504_v9, %s1629_s17 }
 0x40a   :  { %1505 = vtanh.f32 %v1880_v13 }
 0x410   :  { %v1506_v14 = vpop.eup %1505 }
 0x411   :  { %329 = vrot.lane.b32.xlu0 %v1506_v14, %s1629_s17 }
 0x463   :  { %v390_v15 = vpop.permute.xlu2 %389 }
 0x464   :  { %v392_v16 = vmul.f32 %v390_v15, %v375_v42 }
 0x466   :  { %394 = vrot.lane.b32.xlu1 %v392_v16, %s1630_s18 }
 0x483   :  { %v330_v21 = vpop.permute.xlu0 %329 }
 0x484   :  { %v332_v22 = vmul.f32 %v330_v21, %v315_v54 }
 0x486   :  { %419 = vrot.lane.b32.xlu2 %v332_v22, %s1630_s18 }
 0x4d8   :  { %v395_v23 = vpop.permute.xlu1 %394 }
 0x4d9   :  { %1447 = vmatmul.msk.f32.vlgmr.msrb.gmra.mxu2 %vm181_vm10, %v395_v23  ;;  %1450 = vmatmul.msk.f32.vlgmr.msra.gmra.mxu1 %vm181_vm10, %v395_v23 }
 0x4da   :  { %710 = vmatpush.msrb.mxu2 %v1785_v51  ;;  %795 = vmatpush.msra.mxu1 %v1694_v3 }
 0x4dc   :  { %711 = vmatpush.msrb.mxu2 %v1790_v52  ;;  %796 = vmatpush.msra.mxu1 %v1699_v4 }
 0x4de   :  { %712 = vmatpush.msrb.mxu2 %v1808_v56  ;;  %797 = vmatpush.msra.mxu1 %v1708_v6 }
 0x4e0   :  { %v420_v24 = vpop.permute.xlu2 %419  ;;  %713 = vmatpush.msrb.mxu2 %v1824_v60  ;;  %798 = vmatpush.msra.mxu1 %v1723_v10 }
 0x4e1   :  { %1448 = vmatmul.msk.f32.vlgmr.msrb.gmra.mxu3 %vm181_vm10, %v420_v24 }
 0x4e2   :  { %735 = vmatpush.msrb.mxu3 %v1795_v53 }
 0x4e4   :  { %736 = vmatpush.msrb.mxu3 %v1803_v55 }
 0x4e6   :  { %737 = vmatpush.msrb.mxu3 %v1815_v58 }
 0x4e8   :  { %738 = vmatpush.msrb.mxu3 %v1837_v63 }
 0x556   :  { %v500_v28 = vpop.f32.mrf.mxu1 }
 0x557   :  { %v503_v29 = vadd.f32 %v500_v28, %v164_v27 }
 0x559   :  { %v504_v30 = vmul.f32 %v503_v29, %v1766_v26 }
 0x55b   :  { %v1451_v31 = vmul.f32 -1.442695, %v504_v30 }
 0x55c   :  { %v415_v32 = vpop.f32.mrf.mxu2 }
 0x55d   :  { %1507 = vpow2.f32 %v1451_v31  ;;  %v416_v34 = vadd.f32 %v1864_v12, %v415_v32 }
 0x563   :  { %v1508_v33 = vpop.eup %1507 }
 0x564   :  { %v508_v35 = vadd.f32 1.0, %v1508_v33  ;;  %v440_v36 = vpop.f32.mrf.mxu3 }
 0x565   :  { %v443_v37 = vadd.f32 %v440_v36, %v416_v34  ;;  %v62_v34 = vrot.slane %v1713_v7, 2 }
 0x566   :  { %1509 = vrcp.f32 %v508_v35  ;;  %v520_v44 = vand.u32 2147483648, %v508_v35  ;;  %v518_v47 = vand.u32 2147483647, %v508_v35  ;;  %vm514_vm7 = vweird.f32 %v508_v35 }
 0x567   :  { %v444_v38 = vmul.f32 %v443_v37, %v1766_v26 }
 0x568   :  { %v521_v54 = vor.u32 1.1754944e-38, %v520_v44  ;;  %vm519_vm9 = vcmp.eq.f32.partialorder %v518_v47, 8.507059e+37 }
 0x569   :  { %v1449_v39 = vmul.f32 -1.442695, %v444_v38 }
 0x56b   :  { %1511 = vpow2.f32 %v1449_v39 }
 0x56c   :  { %v1510_v40 = vpop.eup %1509 }
 0x56d   :  { %v510_v42 = vmul.f32 %v1510_v40, %v508_v35  ;;  %vm515_vm6 = vweird.f32 %v1510_v40 }
 0x56e   :  { %vm516_vm8 = vmor %vm514_vm7, %vm515_vm6 }
 0x56f   :  { %v511_v43 = vsub.f32 1.0, %v510_v42 }
 0x571   :  { %v1512_v45 = vpop.eup %1511  ;;  %v512_v46 = vmul.f32 %v1510_v40, %v511_v43 }
 0x572   :  { %v448_v48 = vadd.f32 1.0, %v1512_v45 }
 0x573   :  { %v513_v50 = vadd.f32 %v1510_v40, %v512_v46 }
 0x574   :  { %1513 = vrcp.f32 %v448_v48  ;;  %v460_v8 = vand.u32 2147483648, %v448_v48  ;;  %v458_v14 = vand.u32 2147483647, %v448_v48  ;;  %vm454_vm12 = vweird.f32 %v448_v48 }
 0x575   :  { %v517_v57 = vsel %vm516_vm8, %v1510_v40, %v513_v50 }
 0x576   :  { %v522_v59 = vsel %vm519_vm9, %v521_v54, %v517_v57  ;;  %v461_v16 = vor.u32 1.1754944e-38, %v460_v8  ;;  %vm459_vm14 = vcmp.eq.f32.partialorder %v458_v14, 8.507059e+37 }
 0x577   :  { %v524_v61 = vmul.f32 %v522_v59, %v1766_v26 }
 0x579   :  { %v525_v62 = vadd.f32 %v524_v61, %v1772_v41 }
 0x57a   :  { %v1514_v0 = vpop.eup %1513 }
 0x57b   :  { %v450_v1 = vmul.f32 %v1514_v0, %v448_v48  ;;  %528 = vrot.lane.b32.xlu0 %v525_v62, %s1629_s17  ;;  %vm455_vm11 = vweird.f32 %v1514_v0  ;;  %v526_v25 = vmul.f32 %v525_v62, %v1877_v2  ;;  %v60_v2 = vrot.slane %v1729_v11, 3 }
 0x57c   :  { %vm456_vm13 = vmor %vm454_vm12, %vm455_vm11 }
 0x57d   :  { %v451_v5 = vsub.f32 1.0, %v450_v1  ;;  %v64_v35 = vsel %vm45_vm0, %v60_v2, %v62_v34 }
 0x57e   :  { %v65_v36 = vsel %vm47_vm1, %v64_v35, 0.0 }
 0x57f   :  { %v452_v9 = vmul.f32 %v1514_v0, %v451_v5  ;;  %1437 = vmatmul.msk.f32.gmra.mxu0 %vm115_vm2, %v65_v36 }
 0x581   :  { %v453_v15 = vadd.f32 %v1514_v0, %v452_v9 }
 0x583   :  { %v457_v49 = vsel %vm456_vm13, %v1514_v0, %v453_v15 }
 0x584   :  { %v462_v17 = vsel %vm459_vm14, %v461_v16, %v457_v49 }
 0x585   :  { %v464_v18 = vmul.f32 %v462_v17, %v1766_v26 }
 0x587   :  { %v465_v19 = vadd.f32 %v464_v18, %v1772_v41 }
 0x589   :  { %468 = vrot.lane.b32.xlu1 %v465_v19, %s1629_s17  ;;  %v466_v30 = vmul.f32 %v465_v19, %v1880_v13 }
 0x5ed   :  { %v529_v21 = vpop.permute.xlu0 %528 }
 0x5ee   :  { %v531_v22 = vmul.f32 %v529_v21, %v525_v62 }
 0x5f0   :  { %533 = vrot.lane.b32.xlu2 %v531_v22, %s1630_s18 }
 0x5fb   :  { %v469_v23 = vpop.permute.xlu1 %468 }
 0x5fc   :  { %v471_v24 = vmul.f32 %v469_v23, %v465_v19  ;;  %v166_v43 = vpop.f32.mrf.mxu0 }
 0x5fd   :  { %v167_v44 = vadd.f32 %v1757_v20, %v166_v43 }
 0x5fe   :  { %473 = vrot.lane.b32.xlu0 %v471_v24, %s1630_s18 }
 0x64a   :  { %v534_v27 = vpop.permute.xlu2 %533 }
 0x64b   :  { %v1920_v28 = vadd.f32 %v534_v27, %v526_v25 }
 0x64d   :  { %1515 = vtanh.f32 %v1920_v28 }
 0x653   :  { %v1516_v29 = vpop.eup %1515 }
 0x654   :  { %539 = vrot.lane.b32.xlu1 %v1516_v29, %s1629_s17 }
 0x670   :  { %v474_v31 = vpop.permute.xlu0 %473 }
 0x671   :  { %v1925_v32 = vadd.f32 %v474_v31, %v466_v30 }
 0x673   :  { %1517 = vtanh.f32 %v1925_v32 }
 0x679   :  { %v1518_v33 = vpop.eup %1517 }
 0x67a   :  { %479 = vrot.lane.b32.xlu2 %v1518_v33, %s1629_s17 }
 0x6c6   :  { %v540_v37 = vpop.permute.xlu1 %539 }
 0x6c7   :  { %v542_v13 = vmul.f32 %v540_v37, %v525_v62 }
 0x6c9   :  { %544 = vrot.lane.b32.xlu0 %v542_v13, %s1630_s18 }
 0x6d4   :  { %v480_v38 = vpop.permute.xlu2 %479 }
 0x6d5   :  { %v482_v39 = vmul.f32 %v480_v38, %v465_v19 }
 0x6d7   :  { %569 = vrot.lane.b32.xlu1 %v482_v39, %s1630_s18 }
 0x73b   :  { %v545_v40 = vpop.permute.xlu0 %544 }
 0x73c   :  { %1452 = vmatmul.msk.f32.vlgmr.msra.gmra.mxu2 %vm181_vm10, %v545_v40  ;;  %1455 = vmatmul.msk.f32.vlgmr.msrb.gmra.mxu1 %vm181_vm10, %v545_v40 }
 0x73d   :  { %860 = vmatpush.msra.mxu2 %v1785_v51  ;;  %945 = vmatpush.msrb.mxu1 %v1694_v3 }
 0x73f   :  { %861 = vmatpush.msra.mxu2 %v1790_v52  ;;  %946 = vmatpush.msrb.mxu1 %v1699_v4 }
 0x741   :  { %862 = vmatpush.msra.mxu2 %v1808_v56  ;;  %947 = vmatpush.msrb.mxu1 %v1708_v6 }
 0x743   :  { %863 = vmatpush.msra.mxu2 %v1824_v60  ;;  %948 = vmatpush.msrb.mxu1 %v1723_v10 }
 0x749   :  { %v570_v42 = vpop.permute.xlu1 %569 }
 0x74a   :  { %1453 = vmatmul.msk.f32.vlgmr.msra.gmra.mxu3 %vm181_vm10, %v570_v42 }
 0x74b   :  { %885 = vmatpush.msra.mxu3 %v1795_v53 }
 0x74d   :  { %886 = vmatpush.msra.mxu3 %v1803_v55 }
 0x74f   :  { %887 = vmatpush.msra.mxu3 %v1815_v58 }
 0x751   :  { %888 = vmatpush.msra.mxu3 %v1837_v63 }
 0x7b9   :  { %v650_v45 = vpop.f32.mrf.mxu1 }
 0x7ba   :  { %v653_v46 = vadd.f32 %v650_v45, %v167_v44 }
 0x7bc   :  { %v654_v47 = vmul.f32 %v653_v46, %v1766_v26 }
 0x7be   :  { %v1456_v48 = vmul.f32 -1.442695, %v654_v47 }
 0x7bf   :  { %v565_v57 = vpop.f32.mrf.mxu2 }
 0x7c0   :  { %1519 = vpow2.f32 %v1456_v48  ;;  %v566_v59 = vadd.f32 %v1864_v12, %v565_v57  ;;  %v68_v57 = vrot.slane %v1713_v7, 3 }
 0x7c6   :  { %v1520_v50 = vpop.eup %1519 }
 0x7c7   :  { %v658_v54 = vadd.f32 1.0, %v1520_v50 }
 0x7c9   :  { %1521 = vrcp.f32 %v658_v54  ;;  %v670_v14 = vand.u32 2147483648, %v658_v54  ;;  %v668_v16 = vand.u32 2147483647, %v658_v54  ;;  %vm664_vm3 = vweird.f32 %v658_v54 }
 0x7cb   :  { %v671_v17 = vor.u32 1.1754944e-38, %v670_v14  ;;  %vm669_vm5 = vcmp.eq.f32.partialorder %v668_v16, 8.507059e+37 }
 0x7cd   :  { %v590_v61 = vpop.f32.mrf.mxu3 }
 0x7ce   :  { %v593_v62 = vadd.f32 %v590_v61, %v566_v59 }
 0x7cf   :  { %v1522_v0 = vpop.eup %1521 }
 0x7d0   :  { %v660_v1 = vmul.f32 %v1522_v0, %v658_v54  ;;  %v594_v5 = vmul.f32 %v593_v62, %v1766_v26  ;;  %vm665_vm15 = vweird.f32 %v1522_v0 }
 0x7d1   :  { %vm666_vm4 = vmor %vm664_vm3, %vm665_vm15 }
 0x7d2   :  { %v661_v8 = vsub.f32 1.0, %v660_v1  ;;  %v1454_v9 = vmul.f32 -1.442695, %v594_v5 }
 0x7d4   :  { %1523 = vpow2.f32 %v1454_v9  ;;  %v662_v15 = vmul.f32 %v1522_v0, %v661_v8 }
 0x7d6   :  { %v663_v49 = vadd.f32 %v1522_v0, %v662_v15 }
 0x7d8   :  { %v667_v18 = vsel %vm666_vm4, %v1522_v0, %v663_v49 }
 0x7d9   :  { %v672_v19 = vsel %vm669_vm5, %v671_v17, %v667_v18 }
 0x7da   :  { %v1524_v21 = vpop.eup %1523  ;;  %v674_v22 = vmul.f32 %v672_v19, %v1766_v26 }
 0x7db   :  { %v598_v23 = vadd.f32 1.0, %v1524_v21 }
 0x7dc   :  { %v675_v24 = vadd.f32 %v674_v22, %v1772_v41 }
 0x7dd   :  { %1525 = vrcp.f32 %v598_v23  ;;  %v610_v30 = vand.u32 2147483648, %v598_v23  ;;  %v608_v33 = vand.u32 2147483647, %v598_v23  ;;  %vm604_vm7 = vweird.f32 %v598_v23 }
 0x7de   :  { %678 = vrot.lane.b32.xlu2 %v675_v24, %s1629_s17  ;;  %v676_v43 = vmul.f32 %v675_v24, %v1920_v28  ;;  %v66_v28 = vrot.slane %v1729_v11, 4 }
 0x7df   :  { %v611_v34 = vor.u32 1.1754944e-38, %v610_v30  ;;  %vm609_vm9 = vcmp.eq.f32.partialorder %v608_v33, 8.507059e+37 }
 0x7e0   :  { %v70_v59 = vsel %vm45_vm0, %v66_v28, %v68_v57 }
 0x7e1   :  { %v71_v61 = vsel %vm47_vm1, %v70_v59, 0.0 }
 0x7e2   :  { %1438 = vmatmul.msk.f32.gmra.mxu0 %vm115_vm2, %v71_v61 }
 0x7e3   :  { %v1526_v25 = vpop.eup %1525 }
 0x7e4   :  { %v600_v27 = vmul.f32 %v1526_v25, %v598_v23  ;;  %vm605_vm6 = vweird.f32 %v1526_v25 }
 0x7e5   :  { %vm606_vm8 = vmor %vm604_vm7, %vm605_vm6 }
 0x7e6   :  { %v601_v29 = vsub.f32 1.0, %v600_v27 }
 0x7e8   :  { %v602_v31 = vmul.f32 %v1526_v25, %v601_v29 }
 0x7ea   :  { %v603_v2 = vadd.f32 %v1526_v25, %v602_v31 }
 0x7ec   :  { %v607_v35 = vsel %vm606_vm8, %v1526_v25, %v603_v2 }
 0x7ed   :  { %v612_v36 = vsel %vm609_vm9, %v611_v34, %v607_v35 }
 0x7ee   :  { %v614_v37 = vmul.f32 %v612_v36, %v1766_v26 }
 0x7f0   :  { %v615_v13 = vadd.f32 %v614_v37, %v1772_v41 }
 0x7f2   :  { %618 = vrot.lane.b32.xlu0 %v615_v13, %s1629_s17  ;;  %v616_v47 = vmul.f32 %v615_v13, %v1925_v32 }
 0x838   :  { %v679_v38 = vpop.permute.xlu2 %678 }
 0x839   :  { %v681_v39 = vmul.f32 %v679_v38, %v675_v24 }
 0x83b   :  { %683 = vrot.lane.b32.xlu1 %v681_v39, %s1630_s18 }
 0x864   :  { %v619_v40 = vpop.permute.xlu0 %618 }
 0x865   :  { %v621_v42 = vmul.f32 %v619_v40, %v615_v13 }
 0x867   :  { %623 = vrot.lane.b32.xlu2 %v621_v42, %s1630_s18 }
 0x8ad   :  { %v684_v44 = vpop.permute.xlu1 %683 }
 0x8ae   :  { %v1964_v45 = vadd.f32 %v684_v44, %v676_v43 }
 0x8b0   :  { %1527 = vtanh.f32 %v1964_v45 }
 0x8b6   :  { %v1528_v46 = vpop.eup %1527 }
 0x8b7   :  { %689 = vrot.lane.b32.xlu0 %v1528_v46, %s1629_s17 }
 0x8c1   :  { %v624_v48 = vpop.permute.xlu2 %623 }
 0x8c2   :  { %v1969_v50 = vadd.f32 %v624_v48, %v616_v47 }
 0x8c4   :  { %1529 = vtanh.f32 %v1969_v50 }
 0x8ca   :  { %v1530_v54 = vpop.eup %1529 }
 0x8cb   :  { %629 = vrot.lane.b32.xlu1 %v1530_v54, %s1629_s17 }
 0x929   :  { %v690_v62 = vpop.permute.xlu0 %689 }
 0x92a   :  { %v692_v32 = vmul.f32 %v690_v62, %v675_v24 }
 0x92c   :  { %694 = vrot.lane.b32.xlu2 %v692_v32, %s1630_s18 }
 0x93d   :  { %v630_v0 = vpop.permute.xlu1 %629 }
 0x93e   :  { %v632_v1 = vmul.f32 %v630_v0, %v615_v13 }
 0x940   :  { %719 = vrot.lane.b32.xlu0 %v632_v1, %s1630_s18 }
 0x986   :  { %v695_v5 = vpop.permute.xlu2 %694 }
 0x987   :  { %1457 = vmatmul.msk.f32.vlgmr.msrb.gmra.mxu2 %vm181_vm10, %v695_v5  ;;  %1460 = vmatmul.msk.f32.vlgmr.msra.gmra.mxu1 %vm181_vm10, %v695_v5 }
 0x988   :  { %1010 = vmatpush.msrb.mxu2 %v1785_v51  ;;  %1095 = vmatpush.msra.mxu1 %v1694_v3  ;;  %v169_v3 = vpop.f32.mrf.mxu0 }
 0x98a   :  { %1011 = vmatpush.msrb.mxu2 %v1790_v52  ;;  %1096 = vmatpush.msra.mxu1 %v1699_v4  ;;  %v170_v4 = vadd.f32 %v1757_v20, %v169_v3 }
 0x98c   :  { %1012 = vmatpush.msrb.mxu2 %v1808_v56  ;;  %1097 = vmatpush.msra.mxu1 %v1708_v6 }
 0x98e   :  { %1013 = vmatpush.msrb.mxu2 %v1824_v60  ;;  %1098 = vmatpush.msra.mxu1 %v1723_v10 }
 0x9b2   :  { %v720_v8 = vpop.permute.xlu0 %719 }
 0x9b3   :  { %1458 = vmatmul.msk.f32.vlgmr.msrb.gmra.mxu3 %vm181_vm10, %v720_v8 }
 0x9b4   :  { %1035 = vmatpush.msrb.mxu3 %v1795_v53 }
 0x9b6   :  { %1036 = vmatpush.msrb.mxu3 %v1803_v55 }
 0x9b8   :  { %1037 = vmatpush.msrb.mxu3 %v1815_v58 }
 0x9ba   :  { %1038 = vmatpush.msrb.mxu3 %v1837_v63 }
 0xa04   :  { %v800_v9 = vpop.f32.mrf.mxu1 }
 0xa05   :  { %v803_v6 = vadd.f32 %v800_v9, %v170_v4 }
 0xa07   :  { %v804_v14 = vmul.f32 %v803_v6, %v1766_v26 }
 0xa09   :  { %v1461_v15 = vmul.f32 -1.442695, %v804_v14 }
 0xa0a   :  { %v715_v31 = vpop.f32.mrf.mxu2 }
 0xa0b   :  { %1531 = vpow2.f32 %v1461_v15  ;;  %v716_v33 = vadd.f32 %v1864_v12, %v715_v31  ;;  %v72_v15 = vrot.slane %v1729_v11, 5  ;;  %v1586_v11 = vld [vmem:[%s2204_s2 + $0x10] sm:$0xff] }
 0xa11   :  { %v1532_v10 = vpop.eup %1531 }
 0xa12   :  { %v808_v16 = vadd.f32 1.0, %v1532_v10  ;;  %v74_v10 = vrot.slane %v1713_v7, 4  ;;  %v1585_v7 = vld [vmem:[%s2204_s2 + $0x18] sm:$0xff] }
 0xa14   :  { %1533 = vrcp.f32 %v808_v16  ;;  %v820_v19 = vand.u32 2147483648, %v808_v16  ;;  %v818_v22 = vand.u32 2147483647, %v808_v16  ;;  %vm814_vm12 = vweird.f32 %v808_v16 }
 0xa16   :  { %v821_v24 = vor.u32 1.1754944e-38, %v820_v19  ;;  %vm819_vm14 = vcmp.eq.f32.partialorder %v818_v22, 8.507059e+37  ;;  %v1587_v19 = vld [vmem:[%s2204_s2 + $0x8] sm:$0xff] }
 0xa1a   :  { %v1534_v49 = vpop.eup %1533 }
 0xa1b   :  { %v810_v17 = vmul.f32 %v1534_v49, %v808_v16  ;;  %vm815_vm11 = vweird.f32 %v1534_v49  ;;  %v76_v16 = vsel %vm45_vm0, %v72_v15, %v74_v10 }
 0xa1c   :  { %vm816_vm13 = vmor %vm814_vm12, %vm815_vm11 }
 0xa1d   :  { %v811_v18 = vsub.f32 1.0, %v810_v17 }
 0xa1f   :  { %v812_v21 = vmul.f32 %v1534_v49, %v811_v18 }
 0xa21   :  { %v813_v23 = vadd.f32 %v1534_v49, %v812_v21 }
 0xa23   :  { %v817_v25 = vsel %vm816_vm13, %v1534_v49, %v813_v23 }
 0xa24   :  { %v822_v27 = vsel %vm819_vm14, %v821_v24, %v817_v25 }
 0xa25   :  { %v824_v29 = vmul.f32 %v822_v27, %v1766_v26 }
 0xa27   :  { %v825_v30 = vadd.f32 %v824_v29, %v1772_v41 }
 0xa29   :  { %828 = vrot.lane.b32.xlu1 %v825_v30, %s1629_s17  ;;  %v826_v0 = vmul.f32 %v825_v30, %v1964_v45 }
 0xa36   :  { %v740_v2 = vpop.f32.mrf.mxu3 }
 0xa37   :  { %v743_v34 = vadd.f32 %v740_v2, %v716_v33 }
 0xa39   :  { %v744_v35 = vmul.f32 %v743_v34, %v1766_v26 }
 0xa3b   :  { %v1459_v36 = vmul.f32 -1.442695, %v744_v35 }
 0xa3d   :  { %1535 = vpow2.f32 %v1459_v36 }
 0xa43   :  { %v1536_v37 = vpop.eup %1535 }
 0xa44   :  { %v748_v13 = vadd.f32 1.0, %v1536_v37 }
 0xa46   :  { %1537 = vrcp.f32 %v748_v13  ;;  %v760_v42 = vand.u32 2147483648, %v748_v13  ;;  %v758_v44 = vand.u32 2147483647, %v748_v13  ;;  %vm754_vm3 = vweird.f32 %v748_v13 }
 0xa48   :  { %v761_v47 = vor.u32 1.1754944e-38, %v760_v42  ;;  %vm759_vm5 = vcmp.eq.f32.partialorder %v758_v44, 8.507059e+37 }
 0xa4c   :  { %v1538_v38 = vpop.eup %1537 }
 0xa4d   :  { %v750_v39 = vmul.f32 %v1538_v38, %v748_v13  ;;  %vm755_vm15 = vweird.f32 %v1538_v38 }
 0xa4e   :  { %vm756_vm4 = vmor %vm754_vm3, %vm755_vm15 }
 0xa4f   :  { %v751_v40 = vsub.f32 1.0, %v750_v39 }
 0xa51   :  { %v752_v43 = vmul.f32 %v1538_v38, %v751_v40 }
 0xa53   :  { %v753_v46 = vadd.f32 %v1538_v38, %v752_v43 }
 0xa55   :  { %v757_v48 = vsel %vm756_vm4, %v1538_v38, %v753_v46 }
 0xa56   :  { %v762_v54 = vsel %vm759_vm5, %v761_v47, %v757_v48 }
 0xa57   :  { %v764_v28 = vmul.f32 %v762_v54, %v1766_v26 }
 0xa59   :  { %v765_v57 = vadd.f32 %v764_v28, %v1772_v41 }
 0xa5b   :  { %768 = vrot.lane.b32.xlu2 %v765_v57, %s1629_s17  ;;  %v766_v3 = vmul.f32 %v765_v57, %v1969_v50  ;;  %v77_v50 = vsel %vm47_vm1, %v76_v16, 0.0 }
 0xa5c   :  { %1439 = vmatmul.msk.f32.gmra.mxu0 %vm115_vm2, %v77_v50 }
 0xa9b   :  { %v829_v59 = vpop.permute.xlu1 %828 }
 0xa9c   :  { %v831_v61 = vmul.f32 %v829_v59, %v825_v30 }
 0xa9e   :  { %833 = vrot.lane.b32.xlu0 %v831_v61, %s1630_s18 }
 0xab5   :  { %v769_v62 = vpop.permute.xlu2 %768 }
 0xab6   :  { %v771_v32 = vmul.f32 %v769_v62, %v765_v57 }
 0xab8   :  { %773 = vrot.lane.b32.xlu1 %v771_v32, %s1630_s18 }
 0xb10   :  { %v834_v1 = vpop.permute.xlu0 %833 }
 0xb11   :  { %v2008_v5 = vadd.f32 %v834_v1, %v826_v0 }
 0xb13   :  { %1539 = vtanh.f32 %v2008_v5 }
 0xb19   :  { %v1540_v8 = vpop.eup %1539 }
 0xb1a   :  { %839 = vrot.lane.b32.xlu2 %v1540_v8, %s1629_s17 }
 0xb2a   :  { %v774_v4 = vpop.permute.xlu1 %773 }
 0xb2b   :  { %v2013_v9 = vadd.f32 %v774_v4, %v766_v3 }
 0xb2d   :  { %1541 = vtanh.f32 %v2013_v9 }
 0xb33   :  { %v1542_v6 = vpop.eup %1541 }
 0xb34   :  { %779 = vrot.lane.b32.xlu0 %v1542_v6, %s1629_s17 }
 0xb74   :  { %v840_v14 = vpop.permute.xlu2 %839 }
 0xb75   :  { %v842_v45 = vmul.f32 %v840_v14, %v825_v30 }
 0xb77   :  { %844 = vrot.lane.b32.xlu1 %v842_v45, %s1630_s18 }
 0xba6   :  { %v780_v49 = vpop.permute.xlu0 %779 }
 0xba7   :  { %v782_v17 = vmul.f32 %v780_v49, %v765_v57 }
 0xba9   :  { %869 = vrot.lane.b32.xlu2 %v782_v17, %s1630_s18  ;;  %v2073_v17 = vld [vmem:[%s2202_s0] sm:$0xff] }
 0xbe9   :  { %v845_v18 = vpop.permute.xlu1 %844 }
 0xbea   :  { %1462 = vmatmul.msk.f32.vlgmr.msra.gmra.mxu2 %vm181_vm10, %v845_v18  ;;  %1465 = vmatmul.msk.f32.vlgmr.msrb.gmra.mxu1 %vm181_vm10, %v845_v18  ;;  %v78_v18 = vrot.slane %v2073_v17, 6 }
 0xbeb   :  { %1160 = vmatpush.msra.mxu2 %v1785_v51  ;;  %1245 = vmatpush.msrb.mxu1 %v1585_v7  ;;  %v1588_v51 = vld [vmem:[%s2204_s2] sm:$0xff] }
 0xbed   :  { %1161 = vmatpush.msra.mxu2 %v1790_v52  ;;  %1246 = vmatpush.msrb.mxu1 %v1586_v11 }
 0xbef   :  { %1162 = vmatpush.msra.mxu2 %v1808_v56  ;;  %1247 = vmatpush.msrb.mxu1 %v1587_v19  ;;  %v172_v56 = vpop.f32.mrf.mxu0 }
 0xbf0   :  { %v173_v21 = vadd.f32 %v1757_v20, %v172_v56 }
 0xbf1   :  { %1163 = vmatpush.msra.mxu2 %v1824_v60  ;;  %1248 = vmatpush.msrb.mxu1 %v1588_v51 }
 0xc03   :  { %v870_v52 = vpop.permute.xlu2 %869 }
 0xc04   :  { %1463 = vmatmul.msk.f32.vlgmr.msra.gmra.mxu3 %vm181_vm10, %v870_v52 }
 0xc05   :  { %1185 = vmatpush.msra.mxu3 %v1795_v53 }
 0xc07   :  { %1186 = vmatpush.msra.mxu3 %v1803_v55 }
 0xc09   :  { %1187 = vmatpush.msra.mxu3 %v1815_v58 }
 0xc0b   :  { %1188 = vmatpush.msra.mxu3 %v1837_v63 }
 0xc67   :  { %v950_v60 = vpop.f32.mrf.mxu1 }
 0xc68   :  { %v953_v22 = vadd.f32 %v950_v60, %v173_v21  ;;  %v1591_v21 = vld [vmem:[%s2206_s4 + $0x18] sm:$0xff]  ;;  %v1592_v60 = vld [vmem:[%s2206_s4 + $0x10] sm:$0xff] }
 0xc6a   :  { %v954_v23 = vmul.f32 %v953_v22, %v1766_v26  ;;  %v1593_v22 = vld [vmem:[%s2206_s4 + $0x8] sm:$0xff] }
 0xc6c   :  { %v1466_v24 = vmul.f32 -1.442695, %v954_v23  ;;  %v1594_v23 = vld [vmem:[%s2206_s4] sm:$0xff] }
 0xc6d   :  { %v865_v63 = vpop.f32.mrf.mxu2 }
 0xc6e   :  { %1543 = vpow2.f32 %v1466_v24  ;;  %v866_v2 = vadd.f32 %v1864_v12, %v865_v63 }
 0xc74   :  { %v1544_v25 = vpop.eup %1543 }
 0xc75   :  { %v958_v27 = vadd.f32 1.0, %v1544_v25  ;;  %v1595_v25 = vld [vmem:[%s2207_s5 + $0x18] sm:$0xff] }
 0xc77   :  { %1545 = vrcp.f32 %v958_v27  ;;  %v970_v55 = vand.u32 2147483648, %v958_v27  ;;  %v968_v58 = vand.u32 2147483647, %v958_v27  ;;  %vm964_vm7 = vweird.f32 %v958_v27 }
 0xc79   :  { %v971_v20 = vor.u32 1.1754944e-38, %v970_v55  ;;  %vm969_vm9 = vcmp.eq.f32.partialorder %v968_v58, 8.507059e+37  ;;  %v2116_v55 = vld [vmem:[%s2205_s3] ss:$0 sm:$0xff] }
 0xc7d   :  { %v1546_v29 = vpop.eup %1545 }
 0xc7e   :  { %v960_v53 = vmul.f32 %v1546_v29, %v958_v27  ;;  %vm965_vm6 = vweird.f32 %v1546_v29  ;;  %v1596_v27 = vld [vmem:[%s2207_s5 + $0x10] sm:$0xff] }
 0xc7f   :  { %vm966_vm8 = vmor %vm964_vm7, %vm965_vm6 }
 0xc80   :  { %v961_v30 = vsub.f32 1.0, %v960_v53  ;;  %v1598_v53 = vld [vmem:[%s2207_s5] sm:$0xff] }
 0xc82   :  { %v962_v31 = vmul.f32 %v1546_v29, %v961_v30 }
 0xc84   :  { %v963_v33 = vadd.f32 %v1546_v29, %v962_v31 }
 0xc86   :  { %v967_v34 = vsel %vm966_vm8, %v1546_v29, %v963_v33  ;;  %v1597_v29 = vld [vmem:[%s2207_s5 + $0x8] sm:$0xff] }
 0xc87   :  { %v890_v35 = vpop.f32.mrf.mxu3  ;;  %v972_v36 = vsel %vm969_vm9, %v971_v20, %v967_v34 }
 0xc88   :  { %v893_v37 = vadd.f32 %v890_v35, %v866_v2  ;;  %v974_v13 = vmul.f32 %v972_v36, %v1766_v26 }
 0xc8a   :  { %v894_v38 = vmul.f32 %v893_v37, %v1766_v26  ;;  %v975_v39 = vadd.f32 %v974_v13, %v1772_v41 }
 0xc8c   :  { %v1464_v40 = vmul.f32 -1.442695, %v894_v38  ;;  %978 = vrot.lane.b32.xlu0 %v975_v39, %s1629_s17  ;;  %v976_v4 = vmul.f32 %v975_v39, %v2008_v5 }
 0xc8e   :  { %1547 = vpow2.f32 %v1464_v40 }
 0xc94   :  { %v1548_v42 = vpop.eup %1547 }
 0xc95   :  { %v898_v43 = vadd.f32 1.0, %v1548_v42 }
 0xc97   :  { %1549 = vrcp.f32 %v898_v43  ;;  %v910_v47 = vand.u32 2147483648, %v898_v43  ;;  %v908_v54 = vand.u32 2147483647, %v898_v43  ;;  %vm904_vm12 = vweird.f32 %v898_v43 }
 0xc99   :  { %v911_v57 = vor.u32 1.1754944e-38, %v910_v47  ;;  %vm909_vm14 = vcmp.eq.f32.partialorder %v908_v54, 8.507059e+37 }
 0xc9d   :  { %v1550_v44 = vpop.eup %1549 }
 0xc9e   :  { %v900_v12 = vmul.f32 %v1550_v44, %v898_v43  ;;  %vm905_vm11 = vweird.f32 %v1550_v44 }
 0xc9f   :  { %vm906_vm13 = vmor %vm904_vm12, %vm905_vm11 }
 0xca0   :  { %v901_v46 = vsub.f32 1.0, %v900_v12 }
 0xca2   :  { %v902_v48 = vmul.f32 %v1550_v44, %v901_v46 }
 0xca4   :  { %v903_v28 = vadd.f32 %v1550_v44, %v902_v48  ;;  %v2125_v48 = vld [vmem:[%s2208_s6] ss:$0 sm:$0xff] }
 0xca6   :  { %v907_v59 = vsel %vm906_vm13, %v1550_v44, %v903_v28 }
 0xca7   :  { %v912_v61 = vsel %vm909_vm14, %v911_v57, %v907_v59 }
 0xca8   :  { %v914_v62 = vmul.f32 %v912_v61, %v1766_v26 }
 0xcaa   :  { %v915_v32 = vadd.f32 %v914_v62, %v1772_v41 }
 0xcac   :  { %918 = vrot.lane.b32.xlu1 %v915_v32, %s1629_s17  ;;  %v916_v15 = vmul.f32 %v915_v32, %v2013_v9  ;;  %v2079_v9 = vld [vmem:[%s2202_s0 + $0x8] sm:$0xff] }
 0xcad   :  { %v80_v7 = vrot.slane %v2079_v9, 5 }
 0xcaf   :  { %v82_v11 = vsel %vm45_vm0, %v78_v18, %v80_v7 }
 0xcb0   :  { %v83_v19 = vsel %vm47_vm1, %v82_v11, 0.0 }
 0xcb1   :  { %1440 = vmatmul.msk.f32.gmra.mxu0 %vm115_vm2, %v83_v19 }
 0xcfe   :  { %v979_v0 = vpop.permute.xlu0 %978 }
 0xcff   :  { %v981_v1 = vmul.f32 %v979_v0, %v975_v39 }
 0xd01   :  { %983 = vrot.lane.b32.xlu2 %v981_v1, %s1630_s18 }
 0xd1e   :  { %v919_v8 = vpop.permute.xlu1 %918 }
 0xd1f   :  { %v921_v3 = vmul.f32 %v919_v8, %v915_v32 }
 0xd21   :  { %923 = vrot.lane.b32.xlu0 %v921_v3, %s1630_s18 }
 0xd2e   :  { %v175_v30 = vpop.f32.mrf.mxu0 }
 0xd2f   :  { %v176_v31 = vadd.f32 %v2116_v55, %v175_v30 }
 0xd5b   :  { %v984_v6 = vpop.permute.xlu2 %983 }
 0xd5c   :  { %v2060_v14 = vadd.f32 %v984_v6, %v976_v4 }
 0xd5e   :  { %1551 = vtanh.f32 %v2060_v14 }
 0xd64   :  { %v1552_v45 = vpop.eup %1551 }
 0xd65   :  { %989 = vrot.lane.b32.xlu1 %v1552_v45, %s1629_s17 }
 0xd93   :  { %v924_v10 = vpop.permute.xlu0 %923 }
 0xd94   :  { %v2065_v16 = vadd.f32 %v924_v10, %v916_v15 }
 0xd96   :  { %1553 = vtanh.f32 %v2065_v16 }
 0xd9c   :  { %v1554_v50 = vpop.eup %1553 }
 0xd9d   :  { %929 = vrot.lane.b32.xlu2 %v1554_v50, %s1629_s17 }
 0xdd7   :  { %v990_v49 = vpop.permute.xlu1 %989 }
 0xdd8   :  { %v992_v5 = vmul.f32 %v990_v49, %v975_v39 }
 0xdda   :  { %994 = vrot.lane.b32.xlu0 %v992_v5, %s1630_s18 }
 0xdf7   :  { %v930_v51 = vpop.permute.xlu2 %929 }
 0xdf8   :  { %v932_v52 = vmul.f32 %v930_v51, %v915_v32 }
 0xdfa   :  { %1019 = vrot.lane.b32.xlu1 %v932_v52, %s1630_s18 }
 0xe4c   :  { %v995_v56 = vpop.permute.xlu0 %994 }
 0xe4d   :  { %1467 = vmatmul.msk.f32.vlgmr.msrb.gmra.mxu2 %vm181_vm10, %v995_v56  ;;  %1470 = vmatmul.msk.f32.vlgmr.msra.gmra.mxu1 %vm181_vm10, %v995_v56 }
 0xe4e   :  { %1310 = vmatpush.msrb.mxu2 %v1591_v21 }
 0xe50   :  { %1311 = vmatpush.msrb.mxu2 %v1592_v60 }
 0xe52   :  { %1312 = vmatpush.msrb.mxu2 %v1593_v22 }
 0xe54   :  { %1313 = vmatpush.msrb.mxu2 %v1594_v23 }
 0xe6c   :  { %v1020_v24 = vpop.permute.xlu1 %1019 }
 0xe6d   :  { %1468 = vmatmul.msk.f32.vlgmr.msrb.gmra.mxu3 %vm181_vm10, %v1020_v24 }
 0xe6e   :  { %1335 = vmatpush.msrb.mxu3 %v1595_v25 }
 0xe70   :  { %1336 = vmatpush.msrb.mxu3 %v1596_v27  ;;  %v84_v27 = vrot.slane %v2073_v17, 7 }
 0xe72   :  { %1337 = vmatpush.msrb.mxu3 %v1597_v29  ;;  %v86_v29 = vrot.slane %v2079_v9, 6 }
 0xe74   :  { %1338 = vmatpush.msrb.mxu3 %v1598_v53  ;;  %v88_v53 = vsel %vm45_vm0, %v84_v27, %v86_v29 }
 0xeca   :  { %v1100_v58 = vpop.f32.mrf.mxu1 }
 0xecb   :  { %v1103_v63 = vadd.f32 %v1100_v58, %v176_v31 }
 0xecd   :  { %v1104_v33 = vmul.f32 %v1103_v63, %v1766_v26 }
 0xecf   :  { %v1471_v20 = vmul.f32 -1.442695, %v1104_v33 }
 0xed0   :  { %v1015_v46 = vpop.f32.mrf.mxu2 }
 0xed1   :  { %1555 = vpow2.f32 %v1471_v20  ;;  %v1016_v54 = vadd.f32 %v2125_v48, %v1015_v46 }
 0xed7   :  { %v1556_v2 = vpop.eup %1555 }
 0xed8   :  { %v1108_v34 = vadd.f32 1.0, %v1556_v2 }
 0xeda   :  { %1557 = vrcp.f32 %v1108_v34  ;;  %v1120_v13 = vand.u32 2147483648, %v1108_v34  ;;  %v1118_v39 = vand.u32 2147483647, %v1108_v34  ;;  %vm1114_vm3 = vweird.f32 %v1108_v34 }
 0xedc   :  { %v1121_v42 = vor.u32 1.1754944e-38, %v1120_v13  ;;  %vm1119_vm5 = vcmp.eq.f32.partialorder %v1118_v39, 8.507059e+37 }
 0xee0   :  { %v1558_v35 = vpop.eup %1557 }
 0xee1   :  { %v1110_v36 = vmul.f32 %v1558_v35, %v1108_v34  ;;  %vm1115_vm15 = vweird.f32 %v1558_v35 }
 0xee2   :  { %vm1116_vm4 = vmor %vm1114_vm3, %vm1115_vm15 }
 0xee3   :  { %v1111_v37 = vsub.f32 1.0, %v1110_v36 }
 0xee5   :  { %v1112_v38 = vmul.f32 %v1558_v35, %v1111_v37 }
 0xee7   :  { %v1113_v40 = vadd.f32 %v1558_v35, %v1112_v38 }
 0xee9   :  { %v1117_v43 = vsel %vm1116_vm4, %v1558_v35, %v1113_v40 }
 0xeea   :  { %v1122_v44 = vsel %vm1119_vm5, %v1121_v42, %v1117_v43 }
 0xeeb   :  { %v1124_v12 = vmul.f32 %v1122_v44, %v1766_v26 }
 0xeed   :  { %v1125_v47 = vadd.f32 %v1124_v12, %v1772_v41 }
 0xeef   :  { %1128 = vrot.lane.b32.xlu2 %v1125_v47, %s1629_s17  ;;  %v1126_v51 = vmul.f32 %v1125_v47, %v2060_v14 }
 0xef0   :  { %v1040_v28 = vpop.f32.mrf.mxu3 }
 0xef1   :  { %v1043_v57 = vadd.f32 %v1040_v28, %v1016_v54 }
 0xef3   :  { %v1044_v59 = vmul.f32 %v1043_v57, %v1766_v26 }
 0xef5   :  { %v1469_v61 = vmul.f32 -1.442695, %v1044_v59 }
 0xef7   :  { %1559 = vpow2.f32 %v1469_v61 }
 0xefd   :  { %v1560_v62 = vpop.eup %1559 }
 0xefe   :  { %v1048_v32 = vadd.f32 1.0, %v1560_v62 }
 0xf00   :  { %1561 = vrcp.f32 %v1048_v32  ;;  %v1060_v3 = vand.u32 2147483648, %v1048_v32  ;;  %v1058_v6 = vand.u32 2147483647, %v1048_v32  ;;  %vm1054_vm7 = vweird.f32 %v1048_v32 }
 0xf02   :  { %v1061_v15 = vor.u32 1.1754944e-38, %v1060_v3  ;;  %vm1059_vm9 = vcmp.eq.f32.partialorder %v1058_v6, 8.507059e+37 }
 0xf06   :  { %v1562_v0 = vpop.eup %1561 }
 0xf07   :  { %v1050_v1 = vmul.f32 %v1562_v0, %v1048_v32  ;;  %vm1055_vm6 = vweird.f32 %v1562_v0 }
 0xf08   :  { %vm1056_vm8 = vmor %vm1054_vm7, %vm1055_vm6  ;;  %vm1416_vm7 = vcmask 123904  }
 0xf09   :  { %v1051_v8 = vsub.f32 1.0, %v1050_v1 }
 0xf0b   :  { %v1052_v4 = vmul.f32 %v1562_v0, %v1051_v8 }
 0xf0d   :  { %v1053_v45 = vadd.f32 %v1562_v0, %v1052_v4 }
 0xf0f   :  { %v1057_v10 = vsel %vm1056_vm8, %v1562_v0, %v1053_v45 }
 0xf10   :  { %v1062_v50 = vsel %vm1059_vm9, %v1061_v15, %v1057_v10 }
 0xf11   :  { %v1064_v49 = vmul.f32 %v1062_v50, %v1766_v26 }
 0xf13   :  { %v1065_v5 = vadd.f32 %v1064_v49, %v1772_v41 }
 0xf15   :  { %1068 = vrot.lane.b32.xlu0 %v1065_v5, %s1629_s17  ;;  %v1066_v60 = vmul.f32 %v1065_v5, %v2065_v16  ;;  %v89_v16 = vsel %vm47_vm1, %v88_v53, 0.0 }
 0xf16   :  { %1441 = vmatmul.msk.f32.gmra.mxu0 %vm115_vm2, %v89_v16 }
 0xf49   :  { %v1129_v18 = vpop.permute.xlu2 %1128 }
 0xf4a   :  { %v1131_v7 = vmul.f32 %v1129_v18, %v1125_v47 }
 0xf4c   :  { %1133 = vrot.lane.b32.xlu1 %v1131_v7, %s1630_s18 }
 0xf87   :  { %v1069_v11 = vpop.permute.xlu0 %1068 }
 0xf88   :  { %v1071_v19 = vmul.f32 %v1069_v11, %v1065_v5 }
 0xf8a   :  { %1073 = vrot.lane.b32.xlu2 %v1071_v19, %s1630_s18 }
 0xf93   :  { %v178_v17 = vpop.f32.mrf.mxu0 }
 0xf94   :  { %v179_v9 = vadd.f32 %v2116_v55, %v178_v17 }
 0xfbe   :  { %v1134_v52 = vpop.permute.xlu1 %1133 }
 0xfbf   :  { %v2136_v56 = vadd.f32 %v1134_v52, %v1126_v51 }
 0xfc1   :  { %1563 = vtanh.f32 %v2136_v56 }
 0xfc7   :  { %v1564_v21 = vpop.eup %1563 }
 0xfc8   :  { %1139 = vrot.lane.b32.xlu0 %v1564_v21, %s1629_s17 }
 0xfe4   :  { %v1074_v22 = vpop.permute.xlu2 %1073 }
 0xfe5   :  { %v2141_v23 = vadd.f32 %v1074_v22, %v1066_v60 }
 0xfe7   :  { %1565 = vtanh.f32 %v2141_v23 }
 0xfed   :  { %v1566_v24 = vpop.eup %1565 }
 0xfee   :  { %1079 = vrot.lane.b32.xlu1 %v1566_v24, %s1629_s17 }
0x103a   :  { %v1140_v25 = vpop.permute.xlu0 %1139 }
0x103b   :  { %v1142_v14 = vmul.f32 %v1140_v25, %v1125_v47 }
0x103d   :  { %1144 = vrot.lane.b32.xlu2 %v1142_v14, %s1630_s18 }
0x1060   :  { %v1080_v30 = vpop.permute.xlu1 %1079 }
0x1061   :  { %v1082_v31 = vmul.f32 %v1080_v30, %v1065_v5 }
0x1063   :  { %1169 = vrot.lane.b32.xlu0 %v1082_v31, %s1630_s18 }
0x1097   :  { %v1145_v58 = vpop.permute.xlu2 %1144 }
0x1098   :  { %1472 = vmatmul.msk.f32.vlgmr.msra.gmra.mxu2 %vm181_vm10, %v1145_v58  ;;  %1475 = vmatmul.msk.f32.vlgmr.msrb.gmra.mxu1 %vm181_vm10, %v1145_v58 }
0x10d5   :  { %v1170_v63 = vpop.permute.xlu0 %1169 }
0x10d6   :  { %1473 = vmatmul.msk.f32.vlgmr.msra.gmra.mxu3 %vm181_vm10, %v1170_v63 }
0x1115   :  { %v1250_v33 = vpop.f32.mrf.mxu1 }
0x1116   :  { %v1253_v20 = vadd.f32 %v1250_v33, %v179_v9 }
0x1118   :  { %v1254_v2 = vmul.f32 %v1253_v20, %v1766_v26 }
0x111a   :  { %v1476_v34 = vmul.f32 -1.442695, %v1254_v2 }
0x111b   :  { %v1165_v54 = vpop.f32.mrf.mxu2 }
0x111c   :  { %1567 = vpow2.f32 %v1476_v34  ;;  %v1166_v28 = vadd.f32 %v2125_v48, %v1165_v54 }
0x1122   :  { %v1568_v35 = vpop.eup %1567 }
0x1123   :  { %v1258_v36 = vadd.f32 1.0, %v1568_v35 }
0x1125   :  { %1569 = vrcp.f32 %v1258_v36  ;;  %v1270_v39 = vand.u32 2147483648, %v1258_v36  ;;  %v1268_v42 = vand.u32 2147483647, %v1258_v36  ;;  %vm1264_vm1 = vweird.f32 %v1258_v36 }
0x1127   :  { %v1271_v55 = vor.u32 1.1754944e-38, %v1270_v39  ;;  %vm1269_vm11 = vcmp.eq.f32.partialorder %v1268_v42, 8.507059e+37 }
0x112b   :  { %v1570_v37 = vpop.eup %1569 }
0x112c   :  { %v1260_v13 = vmul.f32 %v1570_v37, %v1258_v36  ;;  %vm1265_vm0 = vweird.f32 %v1570_v37 }
0x112d   :  { %vm1266_vm2 = vmor %vm1264_vm1, %vm1265_vm0 }
0x112e   :  { %v1261_v38 = vsub.f32 1.0, %v1260_v13 }
0x1130   :  { %v1262_v40 = vmul.f32 %v1570_v37, %v1261_v38 }
0x1132   :  { %v1263_v43 = vadd.f32 %v1570_v37, %v1262_v40 }
0x1134   :  { %v1267_v44 = vsel %vm1266_vm2, %v1570_v37, %v1263_v43 }
0x1135   :  { %v1272_v12 = vsel %vm1269_vm11, %v1271_v55, %v1267_v44 }
0x1136   :  { %v1274_v46 = vmul.f32 %v1272_v12, %v1766_v26 }
0x1138   :  { %v1275_v47 = vadd.f32 %v1274_v46, %v1772_v41 }
0x113a   :  { %1278 = vrot.lane.b32.xlu1 %v1275_v47, %s1629_s17  ;;  %v1276_v52 = vmul.f32 %v1275_v47, %v2136_v56 }
0x1159   :  { %v1190_v57 = vpop.f32.mrf.mxu3 }
0x115a   :  { %v1193_v59 = vadd.f32 %v1190_v57, %v1166_v28  ;;  %v1386_v57 = vld [vmem:[%s2209_s7 + $0x18] sm:$0xff] }
0x115b   :  { %1408 = vmatpush.msra.mxu1 %v1386_v57 }
0x115c   :  { %v1194_v61 = vmul.f32 %v1193_v59, %v1766_v26  ;;  %v1383_v59 = vld [vmem:[%s2209_s7] sm:$0xff] }
0x115e   :  { %v1474_v62 = vmul.f32 -1.442695, %v1194_v61 }
0x1160   :  { %1571 = vpow2.f32 %v1474_v62 }
0x1166   :  { %v1572_v32 = vpop.eup %1571 }
0x1167   :  { %v1198_v0 = vadd.f32 1.0, %v1572_v32 }
0x1169   :  { %1573 = vrcp.f32 %v1198_v0  ;;  %v1210_v4 = vand.u32 2147483648, %v1198_v0  ;;  %v1208_v45 = vand.u32 2147483647, %v1198_v0  ;;  %vm1204_vm13 = vweird.f32 %v1198_v0 }
0x116b   :  { %v1211_v10 = vor.u32 1.1754944e-38, %v1210_v4  ;;  %vm1209_vm15 = vcmp.eq.f32.partialorder %v1208_v45, 8.507059e+37 }
0x116f   :  { %v1574_v1 = vpop.eup %1573 }
0x1170   :  { %v1200_v8 = vmul.f32 %v1574_v1, %v1198_v0  ;;  %vm1205_vm12 = vweird.f32 %v1574_v1  ;;  %v1488_v0 = vld [vmem:[%s2210_s8] ss:$0 sm:$0xff] }
0x1171   :  { %vm1206_vm14 = vmor %vm1204_vm13, %vm1205_vm12 }
0x1172   :  { %v1201_v3 = vsub.f32 1.0, %v1200_v8 }
0x1174   :  { %v1202_v6 = vmul.f32 %v1574_v1, %v1201_v3 }
0x1176   :  { %v1203_v15 = vadd.f32 %v1574_v1, %v1202_v6 }
0x1178   :  { %v1207_v50 = vsel %vm1206_vm14, %v1574_v1, %v1203_v15 }
0x1179   :  { %v1212_v49 = vsel %vm1209_vm15, %v1211_v10, %v1207_v50 }
0x117a   :  { %v1214_v5 = vmul.f32 %v1212_v49, %v1766_v26 }
0x117c   :  { %v1215_v18 = vadd.f32 %v1214_v5, %v1772_v41 }
0x117e   :  { %1218 = vrot.lane.b32.xlu2 %v1215_v18, %s1629_s17  ;;  %v1216_v24 = vmul.f32 %v1215_v18, %v2141_v23 }
0x11ac   :  { %v1279_v7 = vpop.permute.xlu1 %1278 }
0x11ad   :  { %v1281_v11 = vmul.f32 %v1279_v7, %v1275_v47 }
0x11af   :  { %1283 = vrot.lane.b32.xlu0 %v1281_v11, %s1630_s18 }
0x11d8   :  { %v1219_v19 = vpop.permute.xlu2 %1218 }
0x11d9   :  { %v1221_v51 = vmul.f32 %v1219_v19, %v1215_v18 }
0x11db   :  { %1223 = vrot.lane.b32.xlu1 %v1221_v51, %s1630_s18 }
0x1221   :  { %v1284_v21 = vpop.permute.xlu0 %1283 }
0x1222   :  { %v1286_v60 = vadd.f32 %v1284_v21, %v1276_v52 }
0x1224   :  { %1575 = vtanh.f32 %v1286_v60 }
0x122a   :  { %v1576_v22 = vpop.eup %1575 }
0x122b   :  { %1289 = vrot.lane.b32.xlu2 %v1576_v22, %s1629_s17 }
0x124d   :  { %v1224_v25 = vpop.permute.xlu1 %1223 }
0x124e   :  { %v1226_v14 = vadd.f32 %v1224_v25, %v1216_v24 }
0x1250   :  { %1577 = vtanh.f32 %v1226_v14 }
0x1256   :  { %v1578_v27 = vpop.eup %1577 }
0x1257   :  { %1229 = vrot.lane.b32.xlu0 %v1578_v27, %s1629_s17 }
0x1285   :  { %v1290_v29 = vpop.permute.xlu2 %1289 }
0x1286   :  { %v1292_v53 = vmul.f32 %v1290_v29, %v1275_v47 }
0x1288   :  { %1294 = vrot.lane.b32.xlu1 %v1292_v53, %s1630_s18 }
0x12c9   :  { %v1230_v16 = vpop.permute.xlu0 %1229 }
0x12ca   :  { %v1232_v56 = vmul.f32 %v1230_v16, %v1215_v18 }
0x12cc   :  { %1319 = vrot.lane.b32.xlu2 %v1232_v56, %s1630_s18 }
0x12fa   :  { %v1295_v30 = vpop.permute.xlu1 %1294 }
0x12fb   :  { %1477 = vmatmul.msk.f32.vlgmr.msrb.gmra.mxu2 %vm181_vm10, %v1295_v30 }
0x1326   :  { %v1320_v31 = vpop.permute.xlu2 %1319 }
0x1327   :  { %1478 = vmatmul.msk.f32.vlgmr.msrb.gmra.mxu3 %vm181_vm10, %v1320_v31 }
0x137e   :  { %v1315_v23 = vpop.f32.mrf.mxu2 }
0x137f   :  { %v1316_v58 = vadd.f32 %v2125_v48, %v1315_v23 }
0x13aa   :  { %v1340_v63 = vpop.f32.mrf.mxu3 }
0x13ab   :  { %v1343_v17 = vadd.f32 %v1340_v63, %v1316_v58 }
0x13ad   :  { %v1344_v9 = vmul.f32 %v1343_v17, %v1766_v26 }
0x13af   :  { %v1479_v33 = vmul.f32 -1.442695, %v1344_v9 }
0x13b1   :  { %1579 = vpow2.f32 %v1479_v33 }
0x13b7   :  { %v1580_v20 = vpop.eup %1579 }
0x13b8   :  { %v1348_v2 = vadd.f32 1.0, %v1580_v20 }
0x13ba   :  { %1581 = vrcp.f32 %v1348_v2  ;;  %v1360_v37 = vand.u32 2147483648, %v1348_v2  ;;  %v1358_v38 = vand.u32 2147483647, %v1348_v2  ;;  %vm1354_vm4 = vweird.f32 %v1348_v2 }
0x13bc   :  { %v1361_v48 = vor.u32 1.1754944e-38, %v1360_v37  ;;  %vm1359_vm6 = vcmp.eq.f32.partialorder %v1358_v38, 8.507059e+37 }
0x13c0   :  { %v1582_v34 = vpop.eup %1581 }
0x13c1   :  { %v1350_v35 = vmul.f32 %v1582_v34, %v1348_v2  ;;  %vm1355_vm3 = vweird.f32 %v1582_v34 }
0x13c2   :  { %vm1356_vm5 = vmor %vm1354_vm4, %vm1355_vm3 }
0x13c3   :  { %v1351_v36 = vsub.f32 1.0, %v1350_v35 }
0x13c5   :  { %v1352_v13 = vmul.f32 %v1582_v34, %v1351_v36 }
0x13c7   :  { %v1353_v39 = vadd.f32 %v1582_v34, %v1352_v13 }
0x13c9   :  { %v1357_v40 = vsel %vm1356_vm5, %v1582_v34, %v1353_v39 }
0x13ca   :  { %v1362_v42 = vsel %vm1359_vm6, %v1361_v48, %v1357_v40 }
0x13cb   :  { %v1364_v43 = vmul.f32 %v1362_v42, %v1766_v26  ;;  %v1385_v26 = vld [vmem:[%s2209_s7 + $0x10] sm:$0xff] }
0x13cc   :  { %1409 = vmatpush.msra.mxu1 %v1385_v26 }
0x13cd   :  { %v1365_v55 = vadd.f32 %v1364_v43, %v1772_v41  ;;  %v1384_v41 = vld [vmem:[%s2209_s7 + $0x8] sm:$0xff] }
0x13ce   :  { %1410 = vmatpush.msra.mxu1 %v1384_v41 }
0x13cf   :  { %1368 = vrot.lane.b32.xlu0 %v1365_v55, %s1629_s17  ;;  %v1366_v46 = vmul.f32 %v1365_v55, %v1226_v14 }
0x13d0   :  { %1411 = vmatpush.msra.mxu1 %v1383_v59 }
0x1441   :  { %v1369_v44 = vpop.permute.xlu0 %1368 }
0x1442   :  { %v1371_v12 = vmul.f32 %v1369_v44, %v1365_v55 }
0x1444   :  { %1373 = vrot.lane.b32.xlu1 %v1371_v12, %s1630_s18 }
0x14b6   :  { %v1374_v47 = vpop.permute.xlu1 %1373 }
0x14b7   :  { %v1376_v54 = vadd.f32 %v1374_v47, %v1366_v46 }
0x14b9   :  { %1583 = vtanh.f32 %v1376_v54 }
0x14bf   :  { %v1584_v28 = vpop.eup %1583 }
0x14c0   :  { %1379 = vrot.lane.b32.xlu2 %v1584_v28, %s1629_s17 }
0x151a   :  { %v1380_v61 = vpop.permute.xlu2 %1379 }
0x151b   :  { %v1382_v62 = vmul.f32 %v1380_v61, %v1365_v55 }
0x151d   :  { %1392 = vrot.lane.b32.xlu0 %v1382_v62, %s1630_s18 }
0x158f   :  { %v1393_v32 = vpop.permute.xlu0 %1392 }
0x1590   :  { %1480 = vmatmul.msk.f32.vlgmr.msra.gmra.mxu1 %vm181_vm10, %v1393_v32 }
0x160d   :  { %v1413_v1 = vpop.f32.mrf.mxu1 }
0x160e   :  { %v1414_v8 = vadd.f32 %v1488_v0, %v1413_v1 }
0x1610   :  { %1417 = vst.msk [vmem:[#allocation2] sm:$0x3] %vm1416_vm7, %v1414_v8 }
0x1611   :  { %1428 = dma.vmem_to_hbm [thread:$0]  %s1424_s10, 32, %s1426_s13, [#allocation3]  }
0x1612   :  { %1625 = dma.done.wait [#allocation3], 32  }
0x1613   :  { %1626 = vsyncadd [#allocation3], 4294967264 }
0x1614   :  { %1433 = vsyncpa [#allocation3], 1 }

</bundles_post_ra>
